<compile_context>
chip_gen: v5e
topology: v5e:2x2
jax: 0.10.0
libtpu: 0.0.40
codegen_flags: <defaults>
</compile_context>

<pallas_src>
import math
import numpy as np
import jax
import jax.numpy as jnp
from jax import lax
from jax.experimental import pallas as pl
from jax.experimental.pallas import tpu as pltpu

# ---- model hyperparameters (small, consistent with the module) ----
VOCAB = 100
D_MODEL = 32
N_HEADS = 4
D_K = D_MODEL // N_HEADS
D_FF = 64
SEQ_LEN = 8
N_LAYERS = 2
BATCH = 2
EPS = 1e-12

assert SEQ_LEN % N_HEADS == 0
ROWS_PER_HEAD = SEQ_LEN // N_HEADS      # rows of the scrambled residual per head block

BS = BATCH * SEQ_LEN                    # 16 stacked activation rows
HBS = N_HEADS * BS                      # 64 head-stacked rows (head, batch, seq)

# packed weight-slab layout (per layer, lane width D_FF = 64)
_R_WO = 0                               # rows [0, 32)   : wo   (32, 32) in lanes [0, 32)
_R_W1 = D_MODEL                         # rows [32, 64)  : w1   (32, 64)
_R_W2 = 2 * D_MODEL                     # rows [64, 128) : w2   (64, 32) in lanes [0, 32)
_R_BIAS = 2 * D_MODEL + D_FF            # row  128       : bo lanes [0,32), b2 lanes [32,64)
_R_B1 = _R_BIAS + 1                     # row  129       : b1   (1, 64)
_LAYER_ROWS = 136                       # padded so every layer base is sublane(8)-aligned


# ----------------------------- Pallas kernel ------------------------------
def _layernorm(v, alpha, bias):
    # torch: alpha * (x - mean) / (std + eps) + bias   with unbiased std
    n = v.shape[-1]
    mean = jnp.mean(v, axis=-1, keepdims=True)
    var = jnp.sum((v - mean) ** 2, axis=-1, keepdims=True) / (n - 1)
    inv = pl.reciprocal(jnp.sqrt(var) + EPS, approx=False)
    return alpha * (v - mean) * inv + bias


def bert_fused_kernel(x_ref, consts_ref, wslab_ref, norms_ref, out_ref):
    S, D, H, DK, B = SEQ_LEN, D_MODEL, N_HEADS, D_K, BATCH
    scale = 1.0 / math.sqrt(DK)

    # layer-invariant constants (read once, stay in vregs / VMEM)
    attn_bias = consts_ref[0:HBS, :]            # (64, 64) block-diag -1e9 + padding-mask bias
    perm = consts_ref[HBS:2 * HBS, :]           # (64, 64) exact 0/1 residual permutation

    x = x_ref[...]                              # (B*S, D) = (16, 32), batch stacked on sublanes

    for l in range(N_LAYERS):                   # static unroll -> all slab offsets static
        base = l * _LAYER_ROWS
        wo = wslab_ref[base + _R_WO:base + _R_WO + D, 0:D]              # (32, 32)
        w1 = wslab_ref[base + _R_W1:base + _R_W1 + D, 0:D_FF]           # (32, 64)
        w2 = wslab_ref[base + _R_W2:base + _R_W2 + D_FF, 0:D]           # (64, 32)
        brow = wslab_ref[base + _R_BIAS:base + _R_BIAS + 1, :]          # (1, 64)
        bo = brow[:, 0:D]                                               # (1, 32)
        b2 = brow[:, D:2 * D]                                           # (1, 32)
        b1 = wslab_ref[base + _R_B1:base + _R_B1 + 1, 0:D_FF]           # (1, 64)
        a_att = norms_ref[4 * l + 0]
        c_att = norms_ref[4 * l + 1]
        a_ffn = norms_ref[4 * l + 2]
        c_ffn = norms_ref[4 * l + 3]

        # head-stacked activations, rows ordered (head, batch, seq): (64, 8)
        q = jnp.concatenate([x[:, h * DK:(h + 1) * DK] for h in range(H)], axis=0)

        # block-diagonal scores in ONE wide MXU push; off-diagonal (and masked)
        # entries carry -1e9 and underflow to exact 0 after max-subtraction.
        scores = lax.dot_general(q, q, (((1,), (1,)), ((), ())),
                                 preferred_element_type=jnp.float32) * scale + attn_bias
        scores = scores - jnp.max(scores, axis=-1, keepdims=True)
        p = jnp.exp(scores)
        p = p * pl.reciprocal(jnp.sum(p, axis=-1, keepdims=True), approx=False)

        attn = jnp.dot(p, q, preferred_element_type=jnp.float32)           # (64, 8)
        resid_hs = jnp.dot(perm, q, preferred_element_type=jnp.float32)    # (64, 8), exact gather

        # back to (B*S, D): lane-concat of 8-aligned sublane slices
        attn_flat = jnp.concatenate(
            [attn[h * BS:(h + 1) * BS, :] for h in range(H)], axis=-1)     # (16, 32)
        resid = jnp.concatenate(
            [resid_hs[h * BS:(h + 1) * BS, :] for h in range(H)], axis=-1)  # (16, 32)

        # output projection + (scrambled) residual + layer norm, whole batch at once
        o = jnp.dot(attn_flat, wo, preferred_element_type=jnp.float32) + bo
        y = _layernorm(resid + o, a_att, c_att)

        # feed-forward block, whole batch at once
        h1 = jnp.maximum(jnp.dot(y, w1, preferred_element_type=jnp.float32) + b1, 0.0)
        z = jnp.dot(h1, w2, preferred_element_type=jnp.float32) + b2
        x = _layernorm(y + z, a_ffn, c_ffn)

    # batch-on-lanes output packing: one (S, B*D) = (8, 64) slab, 8-aligned slices
    out_ref[...] = jnp.concatenate([x[b * S:(b + 1) * S, :] for b in range(B)], axis=-1)


# -------------------------- wrapper-side constants --------------------------
def _build_resid_perm():
    # resid_hs[(t*B+b)*S + r, :] = Q[((r//RPH)*B + b)*S + (r%RPH)*H + t, :]
    perm = np.zeros((HBS, HBS), np.float32)
    for t in range(N_HEADS):
        for b in range(BATCH):
            for r in range(SEQ_LEN):
                dst = (t * BATCH + b) * SEQ_LEN + r
                src = ((r // ROWS_PER_HEAD) * BATCH + b) * SEQ_LEN \
                      + (r % ROWS_PER_HEAD) * N_HEADS + t
                perm[dst, src] = 1.0
    return perm


_RESID_PERM = _build_resid_perm()
_BLOCK_ID = np.repeat(np.arange(N_HEADS * BATCH), SEQ_LEN)
_BLOCK_DIAG = (_BLOCK_ID[:, None] == _BLOCK_ID[None, :])        # (64, 64) bool


def _pack_weights(params):
    layers = []
    for l in range(N_LAYERS):
        wo, bo = params["wo"][l], params["bo"][l]
        w1, b1 = params["w1"][l], params["b1"][l]
        w2, b2 = params["w2"][l], params["b2"][l]
        pad = lambda a: jnp.pad(a, ((0, 0), (0, D_FF - a.shape[1])))
        layers.append(jnp.concatenate([
            pad(wo),                                             # rows [0, 32)
            w1,                                                  # rows [32, 64)
            pad(w2),                                             # rows [64, 128)
            jnp.concatenate([bo, b2], axis=-1),                  # row 128
            b1,                                                  # row 129
            jnp.zeros((_LAYER_ROWS - (_R_B1 + 1), D_FF), jnp.float32),
        ], axis=0))
    return jnp.concatenate(layers, axis=0)                       # (272, 64)


def bert_forward(params, input_ids, token_type_ids, attention_mask):
    # Embedding lookups (gathers) are layout glue kept in XLA.
    x = (params["tok"][input_ids]
         + params["pe"][None, :, :]
         + params["seg"][token_type_ids]).astype(jnp.float32)
    x2d = x.reshape(BS, D_MODEL)

    # Block-diagonal additive attention bias merged with the padding mask,
    # rows/cols ordered (head, batch, seq).  Assumes every query row has at
    # least one unmasked key (true for the masks used here), in which case the
    # additive -1e9 form matches the reference's masked_fill after softmax.
    neg = jnp.float32(-1e9)
    mask_add = jnp.where(attention_mask == 0, neg, 0.0).astype(jnp.float32)   # (B, S)
    colbias = jnp.tile(mask_add, (N_HEADS, 1)).reshape(-1)                    # (H*B*S,)
    attn_bias = jnp.where(jnp.asarray(_BLOCK_DIAG), colbias[None, :], neg)    # (64, 64)
    consts = jnp.concatenate([attn_bias, jnp.asarray(_RESID_PERM)], axis=0)   # (128, 64)

    wslab = _pack_weights(params)                                             # (272, 64)
    norms_flat = params["norms"].reshape(-1)                                  # (8,) f32

    vmem = pl.BlockSpec(memory_space=pltpu.MemorySpace.VMEM)
    smem = pl.BlockSpec(memory_space=pltpu.MemorySpace.SMEM)

    out_dense = pl.pallas_call(
        bert_fused_kernel,
        out_shape=jax.ShapeDtypeStruct((SEQ_LEN, BATCH * D_MODEL), jnp.float32),
        in_specs=[vmem, vmem, vmem, smem],
        out_specs=vmem,
    )(x2d, consts, wslab, norms_flat)

    # undo the batch-on-lanes packing -> (B, S, D)
    return out_dense.reshape(SEQ_LEN, BATCH, D_MODEL).transpose(1, 0, 2)


# ------------------------- params / embeddings (glue) -------------------------
def positional_embedding():
    pe = np.zeros((SEQ_LEN, D_MODEL), np.float32)
    for pos in range(SEQ_LEN):
        for i in range(0, D_MODEL, 2):
            pe[pos, i] = math.sin(pos / 10000 ** (2 * i / D_MODEL))
            pe[pos, i + 1] = math.cos(pos / 10000 ** (2 * (i + 1) / D_MODEL))
    return jnp.asarray(pe)


def init_params(key):
    keys = jax.random.split(key, 2 + N_LAYERS)
    tok = jax.random.normal(keys[0], (VOCAB, D_MODEL), jnp.float32)
    seg = jax.random.normal(keys[1], (2, D_MODEL), jnp.float32)

    def lin(k, fan_in, shape):
        b = 1.0 / math.sqrt(fan_in)
        return jax.random.uniform(k, shape, jnp.float32, -b, b)

    wo, bo, w1, b1, w2, b2 = [], [], [], [], [], []
    for l in range(N_LAYERS):
        lk = jax.random.split(keys[2 + l], 6)
        wo.append(lin(lk[0], D_MODEL, (D_MODEL, D_MODEL)))   # stored (in, out)
        bo.append(lin(lk[1], D_MODEL, (1, D_MODEL)))
        w1.append(lin(lk[2], D_MODEL, (D_MODEL, D_FF)))
        b1.append(lin(lk[3], D_MODEL, (1, D_FF)))
        w2.append(lin(lk[4], D_FF, (D_FF, D_MODEL)))
        b2.append(lin(lk[5], D_FF, (1, D_MODEL)))
    norms = jnp.tile(jnp.array([[1.0, 0.0, 1.0, 0.0]], jnp.float32), (N_LAYERS, 1))
    return dict(tok=tok, seg=seg, pe=positional_embedding(),
                wo=jnp.stack(wo), bo=jnp.stack(bo),
                w1=jnp.stack(w1), b1=jnp.stack(b1),
                w2=jnp.stack(w2), b2=jnp.stack(b2), norms=norms)


# ----------------------------- pure-JAX reference -----------------------------
def _ref_block(x, mask, wo, bo, w1, b1, w2, b2, norms):
    B, S, D = x.shape
    q = jnp.transpose(x.reshape(B, S, N_HEADS, D_K), (0, 2, 1, 3))
    scores = jnp.einsum("bhqd,bhkd->bhqk", q, q) / math.sqrt(D_K)
    scores = jnp.where(mask[:, None, None, :] == 0, -1e9, scores)
    w = jax.nn.softmax(scores, axis=-1)
    attn = jnp.einsum("bhqk,bhkd->bhqd", w, q)
    attn = jnp.transpose(attn, (0, 2, 1, 3)).reshape(B, S, D)
    o = attn @ wo + bo
    resid = q.reshape(B, S, D)

    def ln(v, a, b):
        mean = v.mean(-1, keepdims=True)
        std = jnp.sqrt(((v - mean) ** 2).sum(-1, keepdims=True) / (D - 1))
        return a * (v - mean) / (std + EPS) + b

    y = ln(resid + o, norms[0], norms[1])
    z = jnp.maximum(y @ w1 + b1, 0.0) @ w2 + b2
    return ln(y + z, norms[2], norms[3])


def bert_forward_ref(params, input_ids, token_type_ids, attention_mask):
    x = (params["tok"][input_ids]
         + params["pe"][None, :, :]
         + params["seg"][token_type_ids])
    for l in range(N_LAYERS):
        x = _ref_block(x, attention_mask, params["wo"][l], params["bo"][l],
                       params["w1"][l], params["b1"][l], params["w2"][l],
                       params["b2"][l], params["norms"][l])
    return x


# ----------------------------------- main -----------------------------------
if __name__ == "__main__":
    key = jax.random.PRNGKey(0)
    kp, ki, kt = jax.random.split(key, 3)
    params = init_params(kp)

    input_ids = jax.random.randint(ki, (BATCH, SEQ_LEN), 0, VOCAB, dtype=jnp.int32)
    token_type_ids = jax.random.randint(kt, (BATCH, SEQ_LEN), 0, 2, dtype=jnp.int32)
    attention_mask = jnp.array([[1, 1, 1, 1, 1, 1, 0, 0],
                                [1, 1, 1, 1, 1, 1, 1, 1]], dtype=jnp.int32)

    fwd = jax.jit(bert_forward)
    out = jax.block_until_ready(fwd(params, input_ids, token_type_ids, attention_mask))
    ref = jax.block_until_ready(
        bert_forward_ref(params, input_ids, token_type_ids, attention_mask))

    assert out.shape == (BATCH, SEQ_LEN, D_MODEL)
    np.testing.assert_allclose(np.asarray(out), np.asarray(ref), rtol=2e-5, atol=2e-5)
    print("KERNEL_OK")
</pallas_src>

<mosaic_0001>
module attributes {stable_mosaic.version = 11 : i64} {
  func.func @bert_fused_kernel(%arg0: memref<16x32xf32, #tpu.memory_space<vmem>>, %arg1: memref<128x64xf32, #tpu.memory_space<vmem>>, %arg2: memref<272x64xf32, #tpu.memory_space<vmem>>, %arg3: memref<8xf32, #tpu.memory_space<smem>>, %arg4: memref<8x64xf32, #tpu.memory_space<vmem>>) attributes {dimension_semantics = [], scalar_prefetch = 0 : i64, scratch_operands = 0 : i64, tpu.core_type = #tpu.core_type<tc>} {
    %c0 = arith.constant 0 : index
    %c0_0 = arith.constant 0 : index
    %0 = vector.load %arg1[%c0, %c0_0] : memref<128x64xf32, #tpu.memory_space<vmem>>, vector<64x64xf32>
    %c64 = arith.constant 64 : index
    %c0_1 = arith.constant 0 : index
    %1 = vector.load %arg1[%c64, %c0_1] : memref<128x64xf32, #tpu.memory_space<vmem>>, vector<64x64xf32>
    %c0_2 = arith.constant 0 : index
    %c0_3 = arith.constant 0 : index
    %2 = vector.load %arg0[%c0_2, %c0_3] : memref<16x32xf32, #tpu.memory_space<vmem>>, vector<16x32xf32>
    %c0_4 = arith.constant 0 : index
    %c0_5 = arith.constant 0 : index
    %3 = vector.load %arg2[%c0_4, %c0_5] : memref<272x64xf32, #tpu.memory_space<vmem>>, vector<32x32xf32>
    %c32 = arith.constant 32 : index
    %c0_6 = arith.constant 0 : index
    %4 = vector.load %arg2[%c32, %c0_6] : memref<272x64xf32, #tpu.memory_space<vmem>>, vector<32x64xf32>
    %c64_7 = arith.constant 64 : index
    %c0_8 = arith.constant 0 : index
    %5 = vector.load %arg2[%c64_7, %c0_8] : memref<272x64xf32, #tpu.memory_space<vmem>>, vector<64x32xf32>
    %c128 = arith.constant 128 : index
    %c0_9 = arith.constant 0 : index
    %6 = vector.load %arg2[%c128, %c0_9] : memref<272x64xf32, #tpu.memory_space<vmem>>, vector<1x64xf32>
    %7 = vector.extract_strided_slice %6 {offsets = [0, 0], sizes = [1, 32], strides = [1, 1]} : vector<1x64xf32> to vector<1x32xf32>
    %8 = vector.extract_strided_slice %6 {offsets = [0, 32], sizes = [1, 32], strides = [1, 1]} : vector<1x64xf32> to vector<1x32xf32>
    %c129 = arith.constant 129 : index
    %c0_10 = arith.constant 0 : index
    %9 = vector.load %arg2[%c129, %c0_10] : memref<272x64xf32, #tpu.memory_space<vmem>>, vector<1x64xf32>
    %c0_11 = arith.constant 0 : index
    %10 = memref.load %arg3[%c0_11] : memref<8xf32, #tpu.memory_space<smem>>
    %c1 = arith.constant 1 : index
    %11 = memref.load %arg3[%c1] : memref<8xf32, #tpu.memory_space<smem>>
    %c2 = arith.constant 2 : index
    %12 = memref.load %arg3[%c2] : memref<8xf32, #tpu.memory_space<smem>>
    %c3 = arith.constant 3 : index
    %13 = memref.load %arg3[%c3] : memref<8xf32, #tpu.memory_space<smem>>
    %14 = vector.extract_strided_slice %2 {offsets = [0, 0], sizes = [16, 8], strides = [1, 1]} : vector<16x32xf32> to vector<16x8xf32>
    %15 = vector.extract_strided_slice %2 {offsets = [0, 8], sizes = [16, 8], strides = [1, 1]} : vector<16x32xf32> to vector<16x8xf32>
    %16 = vector.extract_strided_slice %2 {offsets = [0, 16], sizes = [16, 8], strides = [1, 1]} : vector<16x32xf32> to vector<16x8xf32>
    %17 = vector.extract_strided_slice %2 {offsets = [0, 24], sizes = [16, 8], strides = [1, 1]} : vector<16x32xf32> to vector<16x8xf32>
    %18 = tpu.concatenate %14, %15, %16, %17 in 0 : vector<16x8xf32>, vector<16x8xf32>, vector<16x8xf32>, vector<16x8xf32> -> vector<64x8xf32>
    %cst = arith.constant dense<0.000000e+00> : vector<64x64xf32>
    %19 = tpu.matmul %18, %18, %cst {dimension_numbers = #tpu.dot_dimension_numbers<[1], [1], [0], [0], [0, 0, 1, 0], [], []>} : vector<64x8xf32>, vector<64x8xf32>, vector<64x64xf32> -> vector<64x64xf32>
    %cst_12 = arith.constant 0.353553385 : f32
    %20 = vector.broadcast %cst_12 : f32 to vector<64x64xf32>
    %21 = arith.mulf %19, %20 : vector<64x64xf32>
    %22 = arith.addf %21, %0 : vector<64x64xf32>
    %cst_13 = arith.constant dense<0xFF800000> : vector<64xf32>
    %23 = vector.multi_reduction <maximumf>, %22, %cst_13 [1] : vector<64x64xf32> to vector<64xf32>
    %24 = vector.shape_cast %23 : vector<64xf32> to vector<64x1xf32>
    %25 = vector.broadcast %24 : vector<64x1xf32> to vector<64x64xf32>
    %26 = arith.subf %22, %25 : vector<64x64xf32>
    %27 = math.exp %26 : vector<64x64xf32>
    %cst_14 = arith.constant dense<0.000000e+00> : vector<64xf32>
    %28 = vector.multi_reduction <add>, %27, %cst_14 [1] : vector<64x64xf32> to vector<64xf32>
    %29 = vector.shape_cast %28 : vector<64xf32> to vector<64x1xf32>
    %30 = tpu.reciprocal %29 : vector<64x1xf32> -> vector<64x1xf32>
    %31 = vector.broadcast %30 : vector<64x1xf32> to vector<64x64xf32>
    %32 = arith.mulf %27, %31 : vector<64x64xf32>
    %cst_15 = arith.constant dense<0.000000e+00> : vector<64x8xf32>
    %33 = tpu.matmul %32, %18, %cst_15 {dimension_numbers = #tpu.dot_dimension_numbers<[1], [0], [0], [1], [0, 0, 1, 1], [], []>} : vector<64x64xf32>, vector<64x8xf32>, vector<64x8xf32> -> vector<64x8xf32>
    %cst_16 = arith.constant dense<0.000000e+00> : vector<64x8xf32>
    %34 = tpu.matmul %1, %18, %cst_16 {dimension_numbers = #tpu.dot_dimension_numbers<[1], [0], [0], [1], [0, 0, 1, 1], [], []>} : vector<64x64xf32>, vector<64x8xf32>, vector<64x8xf32> -> vector<64x8xf32>
    %35 = vector.extract_strided_slice %33 {offsets = [0, 0], sizes = [16, 8], strides = [1, 1]} : vector<64x8xf32> to vector<16x8xf32>
    %36 = vector.extract_strided_slice %33 {offsets = [16, 0], sizes = [16, 8], strides = [1, 1]} : vector<64x8xf32> to vector<16x8xf32>
    %37 = vector.extract_strided_slice %33 {offsets = [32, 0], sizes = [16, 8], strides = [1, 1]} : vector<64x8xf32> to vector<16x8xf32>
    %38 = vector.extract_strided_slice %33 {offsets = [48, 0], sizes = [16, 8], strides = [1, 1]} : vector<64x8xf32> to vector<16x8xf32>
    %39 = tpu.concatenate %35, %36, %37, %38 in 1 : vector<16x8xf32>, vector<16x8xf32>, vector<16x8xf32>, vector<16x8xf32> -> vector<16x32xf32>
    %40 = vector.extract_strided_slice %34 {offsets = [0, 0], sizes = [16, 8], strides = [1, 1]} : vector<64x8xf32> to vector<16x8xf32>
    %41 = vector.extract_strided_slice %34 {offsets = [16, 0], sizes = [16, 8], strides = [1, 1]} : vector<64x8xf32> to vector<16x8xf32>
    %42 = vector.extract_strided_slice %34 {offsets = [32, 0], sizes = [16, 8], strides = [1, 1]} : vector<64x8xf32> to vector<16x8xf32>
    %43 = vector.extract_strided_slice %34 {offsets = [48, 0], sizes = [16, 8], strides = [1, 1]} : vector<64x8xf32> to vector<16x8xf32>
    %44 = tpu.concatenate %40, %41, %42, %43 in 1 : vector<16x8xf32>, vector<16x8xf32>, vector<16x8xf32>, vector<16x8xf32> -> vector<16x32xf32>
    %cst_17 = arith.constant dense<0.000000e+00> : vector<16x32xf32>
    %45 = tpu.matmul %39, %3, %cst_17 {dimension_numbers = #tpu.dot_dimension_numbers<[1], [0], [0], [1], [0, 0, 1, 1], [], []>} : vector<16x32xf32>, vector<32x32xf32>, vector<16x32xf32> -> vector<16x32xf32>
    %46 = vector.broadcast %7 : vector<1x32xf32> to vector<16x32xf32>
    %47 = arith.addf %45, %46 : vector<16x32xf32>
    %48 = arith.addf %44, %47 : vector<16x32xf32>
    %cst_18 = arith.constant dense<0.000000e+00> : vector<16xf32>
    %49 = vector.multi_reduction <add>, %48, %cst_18 [1] : vector<16x32xf32> to vector<16xf32>
    %50 = vector.shape_cast %49 : vector<16xf32> to vector<16x1xf32>
    %cst_19 = arith.constant 3.200000e+01 : f32
    %51 = vector.broadcast %cst_19 : f32 to vector<16x1xf32>
    %52 = arith.divf %50, %51 : vector<16x1xf32>
    %53 = vector.broadcast %52 : vector<16x1xf32> to vector<16x32xf32>
    %54 = arith.subf %48, %53 : vector<16x32xf32>
    %55 = arith.mulf %54, %54 : vector<16x32xf32>
    %cst_20 = arith.constant dense<0.000000e+00> : vector<16xf32>
    %56 = vector.multi_reduction <add>, %55, %cst_20 [1] : vector<16x32xf32> to vector<16xf32>
    %57 = vector.shape_cast %56 : vector<16xf32> to vector<16x1xf32>
    %cst_21 = arith.constant 3.100000e+01 : f32
    %58 = vector.broadcast %cst_21 : f32 to vector<16x1xf32>
    %59 = arith.divf %57, %58 : vector<16x1xf32>
    %60 = math.sqrt %59 : vector<16x1xf32>
    %cst_22 = arith.constant 9.99999996E-13 : f32
    %61 = vector.broadcast %cst_22 : f32 to vector<16x1xf32>
    %62 = arith.addf %60, %61 : vector<16x1xf32>
    %63 = tpu.reciprocal %62 : vector<16x1xf32> -> vector<16x1xf32>
    %64 = vector.broadcast %52 : vector<16x1xf32> to vector<16x32xf32>
    %65 = arith.subf %48, %64 : vector<16x32xf32>
    %66 = vector.broadcast %10 : f32 to vector<16x32xf32>
    %67 = arith.mulf %66, %65 : vector<16x32xf32>
    %68 = vector.broadcast %63 : vector<16x1xf32> to vector<16x32xf32>
    %69 = arith.mulf %67, %68 : vector<16x32xf32>
    %70 = vector.broadcast %11 : f32 to vector<16x32xf32>
    %71 = arith.addf %69, %70 : vector<16x32xf32>
    %cst_23 = arith.constant dense<0.000000e+00> : vector<16x64xf32>
    %72 = tpu.matmul %71, %4, %cst_23 {dimension_numbers = #tpu.dot_dimension_numbers<[1], [0], [0], [1], [0, 0, 1, 1], [], []>} : vector<16x32xf32>, vector<32x64xf32>, vector<16x64xf32> -> vector<16x64xf32>
    %73 = vector.broadcast %9 : vector<1x64xf32> to vector<16x64xf32>
    %74 = arith.addf %72, %73 : vector<16x64xf32>
    %cst_24 = arith.constant 0.000000e+00 : f32
    %75 = vector.broadcast %cst_24 : f32 to vector<16x64xf32>
    %76 = arith.maximumf %74, %75 : vector<16x64xf32>
    %cst_25 = arith.constant dense<0.000000e+00> : vector<16x32xf32>
    %77 = tpu.matmul %76, %5, %cst_25 {dimension_numbers = #tpu.dot_dimension_numbers<[1], [0], [0], [1], [0, 0, 1, 1], [], []>} : vector<16x64xf32>, vector<64x32xf32>, vector<16x32xf32> -> vector<16x32xf32>
    %78 = vector.broadcast %8 : vector<1x32xf32> to vector<16x32xf32>
    %79 = arith.addf %77, %78 : vector<16x32xf32>
    %80 = arith.addf %71, %79 : vector<16x32xf32>
    %cst_26 = arith.constant dense<0.000000e+00> : vector<16xf32>
    %81 = vector.multi_reduction <add>, %80, %cst_26 [1] : vector<16x32xf32> to vector<16xf32>
    %82 = vector.shape_cast %81 : vector<16xf32> to vector<16x1xf32>
    %cst_27 = arith.constant 3.200000e+01 : f32
    %83 = vector.broadcast %cst_27 : f32 to vector<16x1xf32>
    %84 = arith.divf %82, %83 : vector<16x1xf32>
    %85 = vector.broadcast %84 : vector<16x1xf32> to vector<16x32xf32>
    %86 = arith.subf %80, %85 : vector<16x32xf32>
    %87 = arith.mulf %86, %86 : vector<16x32xf32>
    %cst_28 = arith.constant dense<0.000000e+00> : vector<16xf32>
    %88 = vector.multi_reduction <add>, %87, %cst_28 [1] : vector<16x32xf32> to vector<16xf32>
    %89 = vector.shape_cast %88 : vector<16xf32> to vector<16x1xf32>
    %cst_29 = arith.constant 3.100000e+01 : f32
    %90 = vector.broadcast %cst_29 : f32 to vector<16x1xf32>
    %91 = arith.divf %89, %90 : vector<16x1xf32>
    %92 = math.sqrt %91 : vector<16x1xf32>
    %cst_30 = arith.constant 9.99999996E-13 : f32
    %93 = vector.broadcast %cst_30 : f32 to vector<16x1xf32>
    %94 = arith.addf %92, %93 : vector<16x1xf32>
    %95 = tpu.reciprocal %94 : vector<16x1xf32> -> vector<16x1xf32>
    %96 = vector.broadcast %84 : vector<16x1xf32> to vector<16x32xf32>
    %97 = arith.subf %80, %96 : vector<16x32xf32>
    %98 = vector.broadcast %12 : f32 to vector<16x32xf32>
    %99 = arith.mulf %98, %97 : vector<16x32xf32>
    %100 = vector.broadcast %95 : vector<16x1xf32> to vector<16x32xf32>
    %101 = arith.mulf %99, %100 : vector<16x32xf32>
    %102 = vector.broadcast %13 : f32 to vector<16x32xf32>
    %103 = arith.addf %101, %102 : vector<16x32xf32>
    %c136 = arith.constant 136 : index
    %c0_31 = arith.constant 0 : index
    %104 = vector.load %arg2[%c136, %c0_31] : memref<272x64xf32, #tpu.memory_space<vmem>>, vector<32x32xf32>
    %c168 = arith.constant 168 : index
    %c0_32 = arith.constant 0 : index
    %105 = vector.load %arg2[%c168, %c0_32] : memref<272x64xf32, #tpu.memory_space<vmem>>, vector<32x64xf32>
    %c200 = arith.constant 200 : index
    %c0_33 = arith.constant 0 : index
    %106 = vector.load %arg2[%c200, %c0_33] : memref<272x64xf32, #tpu.memory_space<vmem>>, vector<64x32xf32>
    %c264 = arith.constant 264 : index
    %c0_34 = arith.constant 0 : index
    %107 = vector.load %arg2[%c264, %c0_34] : memref<272x64xf32, #tpu.memory_space<vmem>>, vector<1x64xf32>
    %108 = vector.extract_strided_slice %107 {offsets = [0, 0], sizes = [1, 32], strides = [1, 1]} : vector<1x64xf32> to vector<1x32xf32>
    %109 = vector.extract_strided_slice %107 {offsets = [0, 32], sizes = [1, 32], strides = [1, 1]} : vector<1x64xf32> to vector<1x32xf32>
    %c265 = arith.constant 265 : index
    %c0_35 = arith.constant 0 : index
    %110 = vector.load %arg2[%c265, %c0_35] : memref<272x64xf32, #tpu.memory_space<vmem>>, vector<1x64xf32>
    %c4 = arith.constant 4 : index
    %111 = memref.load %arg3[%c4] : memref<8xf32, #tpu.memory_space<smem>>
    %c5 = arith.constant 5 : index
    %112 = memref.load %arg3[%c5] : memref<8xf32, #tpu.memory_space<smem>>
    %c6 = arith.constant 6 : index
    %113 = memref.load %arg3[%c6] : memref<8xf32, #tpu.memory_space<smem>>
    %c7 = arith.constant 7 : index
    %114 = memref.load %arg3[%c7] : memref<8xf32, #tpu.memory_space<smem>>
    %115 = vector.extract_strided_slice %103 {offsets = [0, 0], sizes = [16, 8], strides = [1, 1]} : vector<16x32xf32> to vector<16x8xf32>
    %116 = vector.extract_strided_slice %103 {offsets = [0, 8], sizes = [16, 8], strides = [1, 1]} : vector<16x32xf32> to vector<16x8xf32>
    %117 = vector.extract_strided_slice %103 {offsets = [0, 16], sizes = [16, 8], strides = [1, 1]} : vector<16x32xf32> to vector<16x8xf32>
    %118 = vector.extract_strided_slice %103 {offsets = [0, 24], sizes = [16, 8], strides = [1, 1]} : vector<16x32xf32> to vector<16x8xf32>
    %119 = tpu.concatenate %115, %116, %117, %118 in 0 : vector<16x8xf32>, vector<16x8xf32>, vector<16x8xf32>, vector<16x8xf32> -> vector<64x8xf32>
    %cst_36 = arith.constant dense<0.000000e+00> : vector<64x64xf32>
    %120 = tpu.matmul %119, %119, %cst_36 {dimension_numbers = #tpu.dot_dimension_numbers<[1], [1], [0], [0], [0, 0, 1, 0], [], []>} : vector<64x8xf32>, vector<64x8xf32>, vector<64x64xf32> -> vector<64x64xf32>
    %cst_37 = arith.constant 0.353553385 : f32
    %121 = vector.broadcast %cst_37 : f32 to vector<64x64xf32>
    %122 = arith.mulf %120, %121 : vector<64x64xf32>
    %123 = arith.addf %122, %0 : vector<64x64xf32>
    %cst_38 = arith.constant dense<0xFF800000> : vector<64xf32>
    %124 = vector.multi_reduction <maximumf>, %123, %cst_38 [1] : vector<64x64xf32> to vector<64xf32>
    %125 = vector.shape_cast %124 : vector<64xf32> to vector<64x1xf32>
    %126 = vector.broadcast %125 : vector<64x1xf32> to vector<64x64xf32>
    %127 = arith.subf %123, %126 : vector<64x64xf32>
    %128 = math.exp %127 : vector<64x64xf32>
    %cst_39 = arith.constant dense<0.000000e+00> : vector<64xf32>
    %129 = vector.multi_reduction <add>, %128, %cst_39 [1] : vector<64x64xf32> to vector<64xf32>
    %130 = vector.shape_cast %129 : vector<64xf32> to vector<64x1xf32>
    %131 = tpu.reciprocal %130 : vector<64x1xf32> -> vector<64x1xf32>
    %132 = vector.broadcast %131 : vector<64x1xf32> to vector<64x64xf32>
    %133 = arith.mulf %128, %132 : vector<64x64xf32>
    %cst_40 = arith.constant dense<0.000000e+00> : vector<64x8xf32>
    %134 = tpu.matmul %133, %119, %cst_40 {dimension_numbers = #tpu.dot_dimension_numbers<[1], [0], [0], [1], [0, 0, 1, 1], [], []>} : vector<64x64xf32>, vector<64x8xf32>, vector<64x8xf32> -> vector<64x8xf32>
    %cst_41 = arith.constant dense<0.000000e+00> : vector<64x8xf32>
    %135 = tpu.matmul %1, %119, %cst_41 {dimension_numbers = #tpu.dot_dimension_numbers<[1], [0], [0], [1], [0, 0, 1, 1], [], []>} : vector<64x64xf32>, vector<64x8xf32>, vector<64x8xf32> -> vector<64x8xf32>
    %136 = vector.extract_strided_slice %134 {offsets = [0, 0], sizes = [16, 8], strides = [1, 1]} : vector<64x8xf32> to vector<16x8xf32>
    %137 = vector.extract_strided_slice %134 {offsets = [16, 0], sizes = [16, 8], strides = [1, 1]} : vector<64x8xf32> to vector<16x8xf32>
    %138 = vector.extract_strided_slice %134 {offsets = [32, 0], sizes = [16, 8], strides = [1, 1]} : vector<64x8xf32> to vector<16x8xf32>
    %139 = vector.extract_strided_slice %134 {offsets = [48, 0], sizes = [16, 8], strides = [1, 1]} : vector<64x8xf32> to vector<16x8xf32>
    %140 = tpu.concatenate %136, %137, %138, %139 in 1 : vector<16x8xf32>, vector<16x8xf32>, vector<16x8xf32>, vector<16x8xf32> -> vector<16x32xf32>
    %141 = vector.extract_strided_slice %135 {offsets = [0, 0], sizes = [16, 8], strides = [1, 1]} : vector<64x8xf32> to vector<16x8xf32>
    %142 = vector.extract_strided_slice %135 {offsets = [16, 0], sizes = [16, 8], strides = [1, 1]} : vector<64x8xf32> to vector<16x8xf32>
    %143 = vector.extract_strided_slice %135 {offsets = [32, 0], sizes = [16, 8], strides = [1, 1]} : vector<64x8xf32> to vector<16x8xf32>
    %144 = vector.extract_strided_slice %135 {offsets = [48, 0], sizes = [16, 8], strides = [1, 1]} : vector<64x8xf32> to vector<16x8xf32>
    %145 = tpu.concatenate %141, %142, %143, %144 in 1 : vector<16x8xf32>, vector<16x8xf32>, vector<16x8xf32>, vector<16x8xf32> -> vector<16x32xf32>
    %cst_42 = arith.constant dense<0.000000e+00> : vector<16x32xf32>
    %146 = tpu.matmul %140, %104, %cst_42 {dimension_numbers = #tpu.dot_dimension_numbers<[1], [0], [0], [1], [0, 0, 1, 1], [], []>} : vector<16x32xf32>, vector<32x32xf32>, vector<16x32xf32> -> vector<16x32xf32>
    %147 = vector.broadcast %108 : vector<1x32xf32> to vector<16x32xf32>
    %148 = arith.addf %146, %147 : vector<16x32xf32>
    %149 = arith.addf %145, %148 : vector<16x32xf32>
    %cst_43 = arith.constant dense<0.000000e+00> : vector<16xf32>
    %150 = vector.multi_reduction <add>, %149, %cst_43 [1] : vector<16x32xf32> to vector<16xf32>
    %151 = vector.shape_cast %150 : vector<16xf32> to vector<16x1xf32>
    %cst_44 = arith.constant 3.200000e+01 : f32
    %152 = vector.broadcast %cst_44 : f32 to vector<16x1xf32>
    %153 = arith.divf %151, %152 : vector<16x1xf32>
    %154 = vector.broadcast %153 : vector<16x1xf32> to vector<16x32xf32>
    %155 = arith.subf %149, %154 : vector<16x32xf32>
    %156 = arith.mulf %155, %155 : vector<16x32xf32>
    %cst_45 = arith.constant dense<0.000000e+00> : vector<16xf32>
    %157 = vector.multi_reduction <add>, %156, %cst_45 [1] : vector<16x32xf32> to vector<16xf32>
    %158 = vector.shape_cast %157 : vector<16xf32> to vector<16x1xf32>
    %cst_46 = arith.constant 3.100000e+01 : f32
    %159 = vector.broadcast %cst_46 : f32 to vector<16x1xf32>
    %160 = arith.divf %158, %159 : vector<16x1xf32>
    %161 = math.sqrt %160 : vector<16x1xf32>
    %cst_47 = arith.constant 9.99999996E-13 : f32
    %162 = vector.broadcast %cst_47 : f32 to vector<16x1xf32>
    %163 = arith.addf %161, %162 : vector<16x1xf32>
    %164 = tpu.reciprocal %163 : vector<16x1xf32> -> vector<16x1xf32>
    %165 = vector.broadcast %153 : vector<16x1xf32> to vector<16x32xf32>
    %166 = arith.subf %149, %165 : vector<16x32xf32>
    %167 = vector.broadcast %111 : f32 to vector<16x32xf32>
    %168 = arith.mulf %167, %166 : vector<16x32xf32>
    %169 = vector.broadcast %164 : vector<16x1xf32> to vector<16x32xf32>
    %170 = arith.mulf %168, %169 : vector<16x32xf32>
    %171 = vector.broadcast %112 : f32 to vector<16x32xf32>
    %172 = arith.addf %170, %171 : vector<16x32xf32>
    %cst_48 = arith.constant dense<0.000000e+00> : vector<16x64xf32>
    %173 = tpu.matmul %172, %105, %cst_48 {dimension_numbers = #tpu.dot_dimension_numbers<[1], [0], [0], [1], [0, 0, 1, 1], [], []>} : vector<16x32xf32>, vector<32x64xf32>, vector<16x64xf32> -> vector<16x64xf32>
    %174 = vector.broadcast %110 : vector<1x64xf32> to vector<16x64xf32>
    %175 = arith.addf %173, %174 : vector<16x64xf32>
    %cst_49 = arith.constant 0.000000e+00 : f32
    %176 = vector.broadcast %cst_49 : f32 to vector<16x64xf32>
    %177 = arith.maximumf %175, %176 : vector<16x64xf32>
    %cst_50 = arith.constant dense<0.000000e+00> : vector<16x32xf32>
    %178 = tpu.matmul %177, %106, %cst_50 {dimension_numbers = #tpu.dot_dimension_numbers<[1], [0], [0], [1], [0, 0, 1, 1], [], []>} : vector<16x64xf32>, vector<64x32xf32>, vector<16x32xf32> -> vector<16x32xf32>
    %179 = vector.broadcast %109 : vector<1x32xf32> to vector<16x32xf32>
    %180 = arith.addf %178, %179 : vector<16x32xf32>
    %181 = arith.addf %172, %180 : vector<16x32xf32>
    %cst_51 = arith.constant dense<0.000000e+00> : vector<16xf32>
    %182 = vector.multi_reduction <add>, %181, %cst_51 [1] : vector<16x32xf32> to vector<16xf32>
    %183 = vector.shape_cast %182 : vector<16xf32> to vector<16x1xf32>
    %cst_52 = arith.constant 3.200000e+01 : f32
    %184 = vector.broadcast %cst_52 : f32 to vector<16x1xf32>
    %185 = arith.divf %183, %184 : vector<16x1xf32>
    %186 = vector.broadcast %185 : vector<16x1xf32> to vector<16x32xf32>
    %187 = arith.subf %181, %186 : vector<16x32xf32>
    %188 = arith.mulf %187, %187 : vector<16x32xf32>
    %cst_53 = arith.constant dense<0.000000e+00> : vector<16xf32>
    %189 = vector.multi_reduction <add>, %188, %cst_53 [1] : vector<16x32xf32> to vector<16xf32>
    %190 = vector.shape_cast %189 : vector<16xf32> to vector<16x1xf32>
    %cst_54 = arith.constant 3.100000e+01 : f32
    %191 = vector.broadcast %cst_54 : f32 to vector<16x1xf32>
    %192 = arith.divf %190, %191 : vector<16x1xf32>
    %193 = math.sqrt %192 : vector<16x1xf32>
    %cst_55 = arith.constant 9.99999996E-13 : f32
    %194 = vector.broadcast %cst_55 : f32 to vector<16x1xf32>
    %195 = arith.addf %193, %194 : vector<16x1xf32>
    %196 = tpu.reciprocal %195 : vector<16x1xf32> -> vector<16x1xf32>
    %197 = vector.broadcast %185 : vector<16x1xf32> to vector<16x32xf32>
    %198 = arith.subf %181, %197 : vector<16x32xf32>
    %199 = vector.broadcast %113 : f32 to vector<16x32xf32>
    %200 = arith.mulf %199, %198 : vector<16x32xf32>
    %201 = vector.broadcast %196 : vector<16x1xf32> to vector<16x32xf32>
    %202 = arith.mulf %200, %201 : vector<16x32xf32>
    %203 = vector.broadcast %114 : f32 to vector<16x32xf32>
    %204 = arith.addf %202, %203 : vector<16x32xf32>
    %205 = vector.extract_strided_slice %204 {offsets = [0, 0], sizes = [8, 32], strides = [1, 1]} : vector<16x32xf32> to vector<8x32xf32>
    %206 = vector.extract_strided_slice %204 {offsets = [8, 0], sizes = [8, 32], strides = [1, 1]} : vector<16x32xf32> to vector<8x32xf32>
    %207 = tpu.concatenate %205, %206 in 1 : vector<8x32xf32>, vector<8x32xf32> -> vector<8x64xf32>
    %c0_56 = arith.constant 0 : index
    %c0_57 = arith.constant 0 : index
    %208 = vector.load %arg4[%c0_56, %c0_57] : memref<8x64xf32, #tpu.memory_space<vmem>>, vector<8x64xf32>
    tpu.vector_store %arg4[%c0_56, %c0_57], %207 {strides = array<i32>} : memref<8x64xf32, #tpu.memory_space<vmem>>, vector<8x64xf32>,
    return
  }
}

</mosaic_0001>

<bundles_post_ra>
// kernel: tile.8
= control target key start
LH: loop header
LB: loop body
LE: loop exit
PB: predicated region body
PF: predicated region fallthrough
CT: control target
= control target key end

     0   :  { %s40_s0 = inlined_call_operand.vmem [shape: f32[2,8], index: 0, kind: input, shape index: {}]   ;;  %s41_s1 = inlined_call_operand.vmem [shape: f32[4,2,1,8], index: 1, kind: output, shape index: {}]  }
   0x1   :  { %v4_v0 = vld [vmem:[%s40_s0] sm:$0x3] }
   0x2   :  { %5 = vst [vmem:[%s41_s1] sm:$0x3] %v4_v0 }
   0x3   :  { %12 = vst [vmem:[%s41_s1 + $0x2] sm:$0x3] %v4_v0 }
   0x4   :  { %13 = vst [vmem:[%s41_s1 + $0x4] sm:$0x3] %v4_v0 }
   0x5   :  { %14 = vst [vmem:[%s41_s1 + $0x6] sm:$0x3] %v4_v0 }

// kernel: bert_forward.1
= control target key start
LH: loop header
LB: loop body
LE: loop exit
PB: predicated region body
PF: predicated region fallthrough
CT: control target
= control target key end

     0   :  { %9 = vsyncpa [#allocation3], 0  ;;  %s1794_s18 = smov [#allocation2]   ;;  %s2390_s0 = inlined_call_operand.vmem [shape: f32[16,32], index: 0, kind: input, shape index: {}]   ;;  %s2391_s1 = inlined_call_operand.vmem [shape: f32[128,64], index: 1, kind: input, shape index: {}]   ;;  %s2392_s2 = inlined_call_operand.vmem [shape: f32[272,64], index: 2, kind: input, shape index: {}]   ;;  %s2393_s3 = inlined_call_operand.vmem [shape: f32[8], index: 3, kind: input, shape index: {}]   ;;  %s2394_s4 = inlined_call_operand.vmem [shape: f32[8,64], index: 4, kind: output, shape index: {}]  }
   0x1   :  { %s21_s17 = sshll.u32 %s2393_s3, 4  ;;  %s22_s17 = int_to_ptr.vmem [resolvable:$true] %s21_s17 }
   0x2   :  { %24 = dma.vmem_to_smem %s22_s17, 16, %s1794_s18, [#allocation3]  }
   0x3   :  { %1792 = dma.done.wait [#allocation3], 16  }
   0x4   :  { %1793 = vsyncadd [#allocation3], 4294967280 }
   0x5   :  { %29 = sfence }
   0x6   :  { %v47_v0 = vld [vmem:[%s2390_s0 + $0x8] sm:$0xff]  ;;  %s1795_s21 = smov 104   ;;  %s1796_s22 = smov 112   ;;  %v46_v1 = vld [vmem:[%s2390_s0] sm:$0xff]  ;;  %vm90_vm0 = vcmask 64512   ;;  %vm164_vm1 = vcmask 523264  }
   0x7   :  { %86 = vrot.lane.b32.xlu0 %v47_v0, %s1795_s21  ;;  %80 = vrot.lane.b32.xlu1 %v47_v0, %s1796_s22  ;;  %s1797_s23 = smov 120   ;;  %v30_v9 = vld [vmem:[%s2391_s1] sm:$0xff]  ;;  %v31_v14 = vld [vmem:[%s2391_s1 + $0x8] sm:$0xff]  ;;  %s1798_s5 = smov 8  }
   0x8   :  { %74 = vrot.lane.b32.xlu2 %v47_v0, %s1797_s23  ;;  %v32_v19 = vld [vmem:[%s2391_s1 + $0x10] sm:$0xff]  ;;  %v33_v24 = vld [vmem:[%s2391_s1 + $0x18] sm:$0xff]  ;;  %v34_v29 = vld [vmem:[%s2391_s1 + $0x20] sm:$0xff]  ;;  %s1799_s6 = smov 16   ;;  %s1800_s7 = smov 24  }
   0x9   :  { %v35_v34 = vld [vmem:[%s2391_s1 + $0x28] sm:$0xff]  ;;  %v36_v39 = vld [vmem:[%s2391_s1 + $0x30] sm:$0xff]  ;;  %v37_v44 = vld [vmem:[%s2391_s1 + $0x38] sm:$0xff]  ;;  %s2077_s27 = sld [smem:[#allocation2]]  ;;  %s1803_s16 = smov 96  }
   0xa   :  { %s2079_s28 = sld [smem:[#allocation2 + $0x1]] }
   0xb   :  { %s2130_s26 = sld [smem:[#allocation2 + $0x2]] }
   0xc   :  { %s2324_s30 = sld [smem:[#allocation2 + $0x4]] }
   0xd   :  { %s2326_s8 = sld [smem:[#allocation2 + $0x5]] }
   0xf   :  { %84 = vrot.lane.b32.xlu0 %v46_v1, %s1795_s21  ;;  %78 = vrot.lane.b32.xlu1 %v46_v1, %s1796_s22 }
  0x10   :  { %72 = vrot.lane.b32.xlu2 %v46_v1, %s1797_s23 }
  0x62   :  { %v75_v4 = vpop.permute.xlu2 %74 }
  0x6a   :  { %v73_v7 = vpop.permute.xlu2 %72 }
  0x79   :  { %v87_v2 = vpop.permute.xlu0 %86  ;;  %v81_v3 = vpop.permute.xlu1 %80 }
  0x7a   :  { %1577 = vmatpush.xpose.msk.msra.mxu0 %vm90_vm0, %v87_v2  ;;  %389 = vmatpush.msra.mxu1 %v87_v2 }
  0x7b   :  { %454 = vmatpush.msra.mxu2 %v87_v2 }
  0x81   :  { %v85_v5 = vpop.permute.xlu0 %84  ;;  %v79_v6 = vpop.permute.xlu1 %78 }
  0x82   :  { %1578 = vmatpush.xpose.msk.msra.mxu0 %vm90_vm0, %v85_v5  ;;  %390 = vmatpush.msra.mxu1 %v85_v5 }
  0x83   :  { %455 = vmatpush.msra.mxu2 %v85_v5 }
  0x84   :  { %391 = vmatpush.msra.mxu1 %v81_v3 }
  0x85   :  { %456 = vmatpush.msra.mxu2 %v81_v3 }
  0x86   :  { %1579 = vmatpush.xpose.msk.msra.mxu0 %vm90_vm0, %v81_v3  ;;  %392 = vmatpush.msra.mxu1 %v79_v6 }
  0x87   :  { %457 = vmatpush.msra.mxu2 %v79_v6 }
  0x88   :  { %393 = vmatpush.msra.mxu1 %v75_v4 }
  0x89   :  { %458 = vmatpush.msra.mxu2 %v75_v4 }
  0x8a   :  { %1580 = vmatpush.xpose.msk.msra.mxu0 %vm90_vm0, %v79_v6  ;;  %394 = vmatpush.msra.mxu1 %v73_v7 }
  0x8b   :  { %459 = vmatpush.msra.mxu2 %v73_v7 }
  0x8c   :  { %395 = vmatpush.msra.mxu1 %v47_v0 }
  0x8d   :  { %460 = vmatpush.msra.mxu2 %v47_v0 }
  0x8e   :  { %1581 = vmatpush.xpose.msk.msra.mxu0 %vm90_vm0, %v75_v4  ;;  %396 = vmatpush.msra.mxu1 %v46_v1 }
  0x8f   :  { %461 = vmatpush.msra.mxu2 %v46_v1 }
  0x92   :  { %1582 = vmatpush.xpose.msk.msra.mxu0 %vm90_vm0, %v73_v7 }
  0x96   :  { %1583 = vmatpush.xpose.msk.msra.mxu0 %vm90_vm0, %v47_v0 }
  0x9a   :  { %1584 = vmatpush.xpose.msk.msra.mxu0 %vm90_vm0, %v46_v1 }
  0x9d   :  { %1585 = vmatmul.msk.f32.vlgmr.msra.gmra.mxu0 %vm90_vm0, %v46_v1 }
  0xa5   :  { %1586 = vmatmul.msk.f32.gmra.mxu0 %vm90_vm0, %v47_v0 }
  0xad   :  { %1587 = vmatmul.msk.f32.gmra.mxu0 %vm90_vm0, %v73_v7 }
  0xb5   :  { %1588 = vmatmul.msk.f32.gmra.mxu0 %vm90_vm0, %v75_v4 }
  0xbd   :  { %1589 = vmatmul.msk.f32.gmra.mxu0 %vm90_vm0, %v79_v6 }
  0xc5   :  { %1590 = vmatmul.msk.f32.gmra.mxu0 %vm90_vm0, %v81_v3 }
  0xcd   :  { %1591 = vmatmul.msk.f32.gmra.mxu0 %vm90_vm0, %v85_v5 }
  0xd5   :  { %1592 = vmatmul.msk.f32.gmra.mxu0 %vm90_vm0, %v87_v2 }
 0x11a   :  { %v124_v8 = vpop.f32.mrf.mxu0 }
 0x11b   :  { %v148_v10 = vmul.f32 0.35355338, %v124_v8 }
 0x11d   :  { %v156_v11 = vadd.f32 %v148_v10, %v30_v9 }
 0x11f   :  { %v165_v12 = vsel %vm164_vm1, %v156_v11, -inf }
 0x120   :  { %166 = vmax.xlane.f32.xlu0 %v165_v12 }
 0x122   :  { %v127_v13 = vpop.f32.mrf.mxu0 }
 0x123   :  { %v149_v15 = vmul.f32 0.35355338, %v127_v13 }
 0x125   :  { %v157_v16 = vadd.f32 %v149_v15, %v31_v14 }
 0x127   :  { %v168_v17 = vsel %vm164_vm1, %v157_v16, -inf }
 0x128   :  { %169 = vmax.xlane.f32.xlu1 %v168_v17 }
 0x12a   :  { %v130_v18 = vpop.f32.mrf.mxu0 }
 0x12b   :  { %v150_v20 = vmul.f32 0.35355338, %v130_v18 }
 0x12d   :  { %v158_v21 = vadd.f32 %v150_v20, %v32_v19 }
 0x12f   :  { %v171_v22 = vsel %vm164_vm1, %v158_v21, -inf }
 0x130   :  { %172 = vmax.xlane.f32.xlu2 %v171_v22 }
 0x132   :  { %v133_v23 = vpop.f32.mrf.mxu0 }
 0x133   :  { %v151_v25 = vmul.f32 0.35355338, %v133_v23 }
 0x135   :  { %v159_v26 = vadd.f32 %v151_v25, %v33_v24  ;;  %v1928_v24 = vld [vmem:[%s2391_s1 + $0x40] sm:$0xff] }
 0x136   :  { %1601 = vmatmul.msk.f32.vlgmr.msra.gmra.mxu2 %vm164_vm1, %v1928_v24 }
 0x137   :  { %v174_v27 = vsel %vm164_vm1, %v159_v26, -inf }
 0x138   :  { %175 = vmax.xlane.f32.xlu2 %v174_v27 }
 0x13a   :  { %v136_v28 = vpop.f32.mrf.mxu0 }
 0x13b   :  { %v152_v30 = vmul.f32 0.35355338, %v136_v28 }
 0x13d   :  { %v160_v31 = vadd.f32 %v152_v30, %v34_v29 }
 0x13f   :  { %v177_v32 = vsel %vm164_vm1, %v160_v31, -inf }
 0x140   :  { %178 = vmax.xlane.f32.xlu0 %v177_v32 }
 0x142   :  { %v139_v33 = vpop.f32.mrf.mxu0 }
 0x143   :  { %v153_v35 = vmul.f32 0.35355338, %v139_v33 }
 0x145   :  { %v161_v36 = vadd.f32 %v153_v35, %v35_v34  ;;  %v1942_v35 = vld [vmem:[%s2391_s1 + $0x50] sm:$0xff] }
 0x147   :  { %v180_v37 = vsel %vm164_vm1, %v161_v36, -inf }
 0x148   :  { %181 = vmax.xlane.f32.xlu1 %v180_v37 }
 0x14a   :  { %v142_v38 = vpop.f32.mrf.mxu0 }
 0x14b   :  { %v154_v40 = vmul.f32 0.35355338, %v142_v38 }
 0x14d   :  { %v162_v41 = vadd.f32 %v154_v40, %v36_v39 }
 0x14f   :  { %v183_v42 = vsel %vm164_vm1, %v162_v41, -inf }
 0x150   :  { %184 = vmax.xlane.f32.xlu2 %v183_v42 }
 0x152   :  { %v145_v43 = vpop.f32.mrf.mxu0 }
 0x153   :  { %v155_v45 = vmul.f32 0.35355338, %v145_v43 }
 0x155   :  { %v163_v46 = vadd.f32 %v155_v45, %v37_v44 }
 0x157   :  { %v186_v47 = vsel %vm164_vm1, %v163_v46, -inf }
 0x158   :  { %187 = vmax.xlane.f32.xlu1 %v186_v47 }
 0x193   :  { %v167_v48 = vpop.xlane.xlu0 %166 }
 0x194   :  { %v189_v49 = vsub.f32 %v156_v11, %v167_v48  ;;  %v1951_v48 = vld [vmem:[%s2391_s1 + $0x58] sm:$0xff] }
 0x196   :  { %v197_v50 = vmul.f32 1.442695, %v189_v49 }
 0x198   :  { %1672 = vpow2.f32 %v197_v50 }
 0x19b   :  { %v170_v51 = vpop.xlane.xlu1 %169 }
 0x19c   :  { %v190_v52 = vsub.f32 %v157_v16, %v170_v51 }
 0x19e   :  { %v1893_v53 = vpop.eup %1672  ;;  %v199_v54 = vmul.f32 1.442695, %v190_v52 }
 0x19f   :  { %v213_v55 = vsel %vm164_vm1, %v1893_v53, 0.0 }
 0x1a0   :  { %1674 = vpow2.f32 %v199_v54  ;;  %214 = vadd.xlane.f32.xlu0 %v213_v55 }
 0x1a3   :  { %v173_v56 = vpop.xlane.xlu2 %172 }
 0x1a4   :  { %v191_v57 = vsub.f32 %v158_v21, %v173_v56 }
 0x1a6   :  { %v1897_v58 = vpop.eup %1674  ;;  %v201_v59 = vmul.f32 1.442695, %v191_v57 }
 0x1a7   :  { %v216_v60 = vsel %vm164_vm1, %v1897_v58, 0.0 }
 0x1a8   :  { %1676 = vpow2.f32 %v201_v59  ;;  %217 = vadd.xlane.f32.xlu2 %v216_v60 }
 0x1ab   :  { %v176_v61 = vpop.xlane.xlu2 %175 }
 0x1ac   :  { %v192_v62 = vsub.f32 %v159_v26, %v176_v61  ;;  %v1935_v26 = vld [vmem:[%s2391_s1 + $0x48] sm:$0xff] }
 0x1ad   :  { %1602 = vmatmul.msk.f32.gmra.mxu2 %vm164_vm1, %v1935_v26 }
 0x1ae   :  { %v1901_v63 = vpop.eup %1676  ;;  %v203_v0 = vmul.f32 1.442695, %v192_v62  ;;  %v1960_v62 = vld [vmem:[%s2391_s1 + $0x60] sm:$0xff] }
 0x1af   :  { %v219_v1 = vsel %vm164_vm1, %v1901_v63, 0.0 }
 0x1b0   :  { %1678 = vpow2.f32 %v203_v0  ;;  %220 = vadd.xlane.f32.xlu0 %v219_v1 }
 0x1b3   :  { %v179_v2 = vpop.xlane.xlu0 %178 }
 0x1b4   :  { %v193_v3 = vsub.f32 %v160_v31, %v179_v2 }
 0x1b5   :  { %1603 = vmatmul.msk.f32.gmra.mxu2 %vm164_vm1, %v1942_v35 }
 0x1b6   :  { %v1905_v4 = vpop.eup %1678  ;;  %v205_v5 = vmul.f32 1.442695, %v193_v3 }
 0x1b7   :  { %v222_v6 = vsel %vm164_vm1, %v1905_v4, 0.0 }
 0x1b8   :  { %1680 = vpow2.f32 %v205_v5  ;;  %223 = vadd.xlane.f32.xlu1 %v222_v6 }
 0x1bb   :  { %v182_v7 = vpop.xlane.xlu1 %181 }
 0x1bc   :  { %v194_v8 = vsub.f32 %v161_v36, %v182_v7 }
 0x1bd   :  { %1604 = vmatmul.msk.f32.gmra.mxu2 %vm164_vm1, %v1951_v48 }
 0x1be   :  { %v1909_v9 = vpop.eup %1680  ;;  %v207_v10 = vmul.f32 1.442695, %v194_v8 }
 0x1bf   :  { %v225_v11 = vsel %vm164_vm1, %v1909_v9, 0.0 }
 0x1c0   :  { %1682 = vpow2.f32 %v207_v10  ;;  %226 = vadd.xlane.f32.xlu2 %v225_v11 }
 0x1c3   :  { %v185_v12 = vpop.xlane.xlu2 %184 }
 0x1c4   :  { %v195_v13 = vsub.f32 %v162_v41, %v185_v12  ;;  %v1969_v12 = vld [vmem:[%s2391_s1 + $0x68] sm:$0xff] }
 0x1c5   :  { %1605 = vmatmul.msk.f32.gmra.mxu2 %vm164_vm1, %v1960_v62 }
 0x1c6   :  { %v1913_v14 = vpop.eup %1682  ;;  %v209_v15 = vmul.f32 1.442695, %v195_v13 }
 0x1c7   :  { %v228_v16 = vsel %vm164_vm1, %v1913_v14, 0.0 }
 0x1c8   :  { %1684 = vpow2.f32 %v209_v15  ;;  %229 = vadd.xlane.f32.xlu0 %v228_v16 }
 0x1cb   :  { %v188_v17 = vpop.xlane.xlu1 %187 }
 0x1cc   :  { %v196_v18 = vsub.f32 %v163_v46, %v188_v17 }
 0x1cd   :  { %1606 = vmatmul.msk.f32.gmra.mxu2 %vm164_vm1, %v1969_v12 }
 0x1ce   :  { %v1917_v19 = vpop.eup %1684  ;;  %v211_v20 = vmul.f32 1.442695, %v196_v18 }
 0x1cf   :  { %v231_v21 = vsel %vm164_vm1, %v1917_v19, 0.0 }
 0x1d0   :  { %1686 = vpow2.f32 %v211_v20  ;;  %232 = vadd.xlane.f32.xlu1 %v231_v21 }
 0x1d6   :  { %v1921_v22 = vpop.eup %1686 }
 0x1d7   :  { %v234_v23 = vsel %vm164_vm1, %v1921_v22, 0.0 }
 0x1d8   :  { %235 = vadd.xlane.f32.xlu2 %v234_v23 }
 0x213   :  { %v215_v25 = vpop.xlane.xlu0 %214 }
 0x214   :  { %1688 = vrcp.f32 %v215_v25  ;;  %v248_v31 = vand.u32 2147483648, %v215_v25  ;;  %v246_v33 = vand.u32 2147483647, %v215_v25  ;;  %vm242_vm3 = vweird.f32 %v215_v25 }
 0x216   :  { %v249_v37 = vor.u32 1.1754944e-38, %v248_v31  ;;  %vm247_vm5 = vcmp.eq.f32.partialorder %v246_v33, 8.507059e+37 }
 0x21a   :  { %v1689_v27 = vpop.eup %1688 }
 0x21b   :  { %v238_v28 = vmul.f32 %v1689_v27, %v215_v25  ;;  %v218_v29 = vpop.xlane.xlu2 %217  ;;  %vm243_vm2 = vweird.f32 %v1689_v27 }
 0x21c   :  { %1690 = vrcp.f32 %v218_v29  ;;  %vm244_vm4 = vmor %vm242_vm3, %vm243_vm2  ;;  %v262_v44 = vand.u32 2147483648, %v218_v29  ;;  %v260_v46 = vand.u32 2147483647, %v218_v29  ;;  %vm256_vm7 = vweird.f32 %v218_v29 }
 0x21d   :  { %v239_v30 = vsub.f32 1.0, %v238_v28 }
 0x21e   :  { %v263_v50 = vor.u32 1.1754944e-38, %v262_v44  ;;  %vm261_vm9 = vcmp.eq.f32.partialorder %v260_v46, 8.507059e+37 }
 0x21f   :  { %v240_v32 = vmul.f32 %v1689_v27, %v239_v30 }
 0x221   :  { %v241_v34 = vadd.f32 %v1689_v27, %v240_v32 }
 0x222   :  { %v1691_v36 = vpop.eup %1690 }
 0x223   :  { %v252_v38 = vmul.f32 %v1691_v36, %v218_v29  ;;  %v221_v39 = vpop.xlane.xlu0 %220  ;;  %v245_v40 = vsel %vm244_vm4, %v1689_v27, %v241_v34  ;;  %vm257_vm6 = vweird.f32 %v1691_v36  ;;  %v1978_v29 = vld [vmem:[%s2391_s1 + $0x70] sm:$0xff] }
 0x224   :  { %1692 = vrcp.f32 %v221_v39  ;;  %v250_v41 = vsel %vm247_vm5, %v249_v37, %v245_v40  ;;  %vm258_vm8 = vmor %vm256_vm7, %vm257_vm6  ;;  %v276_v57 = vand.u32 2147483648, %v221_v39  ;;  %v274_v60 = vand.u32 2147483647, %v221_v39  ;;  %1607 = vmatmul.msk.f32.gmra.mxu2 %vm164_vm1, %v1978_v29 }
 0x225   :  { %v253_v42 = vsub.f32 1.0, %v252_v38  ;;  %v349_v43 = vmul.f32 %v1893_v53, %v250_v41  ;;  %vm270_vm11 = vweird.f32 %v221_v39 }
 0x226   :  { %v277_v1 = vor.u32 1.1754944e-38, %v276_v57  ;;  %vm275_vm13 = vcmp.eq.f32.partialorder %v274_v60, 8.507059e+37 }
 0x227   :  { %v254_v45 = vmul.f32 %v1691_v36, %v253_v42  ;;  %1593 = vmatmul.msk.f32.vlgmr.msra.gmra.mxu1 %vm164_vm1, %v349_v43  ;;  %v1987_v42 = vld [vmem:[%s2391_s1 + $0x78] sm:$0xff] }
 0x229   :  { %v255_v47 = vadd.f32 %v1691_v36, %v254_v45 }
 0x22a   :  { %v1693_v49 = vpop.eup %1692 }
 0x22b   :  { %v266_v51 = vmul.f32 %v1693_v49, %v221_v39  ;;  %v224_v52 = vpop.xlane.xlu1 %223  ;;  %v259_v53 = vsel %vm258_vm8, %v1691_v36, %v255_v47  ;;  %vm271_vm10 = vweird.f32 %v1693_v49 }
 0x22c   :  { %1694 = vrcp.f32 %v224_v52  ;;  %v264_v54 = vsel %vm261_vm9, %v263_v50, %v259_v53  ;;  %vm272_vm12 = vmor %vm270_vm11, %vm271_vm10  ;;  %v290_v8 = vand.u32 2147483648, %v224_v52  ;;  %v288_v11 = vand.u32 2147483647, %v224_v52  ;;  %1608 = vmatmul.msk.f32.gmra.mxu2 %vm164_vm1, %v1987_v42 }
 0x22d   :  { %v267_v55 = vsub.f32 1.0, %v266_v51  ;;  %v350_v56 = vmul.f32 %v1897_v58, %v264_v54  ;;  %vm284_vm15 = vweird.f32 %v224_v52 }
 0x22e   :  { %v291_v16 = vor.u32 1.1754944e-38, %v290_v8  ;;  %vm289_vm3 = vcmp.eq.f32.partialorder %v288_v11, 8.507059e+37  ;;  %v463_v11 = vpop.f32.mrf.mxu2 }
 0x22f   :  { %v268_v59 = vmul.f32 %v1693_v49, %v267_v55  ;;  %1594 = vmatmul.msk.f32.gmra.mxu1 %vm164_vm1, %v350_v56 }
 0x231   :  { %v269_v61 = vadd.f32 %v1693_v49, %v268_v59 }
 0x232   :  { %v1695_v0 = vpop.eup %1694 }
 0x233   :  { %v280_v58 = vmul.f32 %v1695_v0, %v224_v52  ;;  %v227_v2 = vpop.xlane.xlu2 %226  ;;  %v273_v3 = vsel %vm272_vm12, %v1693_v49, %v269_v61  ;;  %vm285_vm14 = vweird.f32 %v1695_v0 }
 0x234   :  { %1696 = vrcp.f32 %v227_v2  ;;  %v278_v5 = vsel %vm275_vm13, %v277_v1, %v273_v3  ;;  %vm286_vm2 = vmor %vm284_vm15, %vm285_vm14  ;;  %v304_v25 = vand.u32 2147483648, %v227_v2  ;;  %v302_v28 = vand.u32 2147483647, %v227_v2 }
 0x235   :  { %v281_v6 = vsub.f32 1.0, %v280_v58  ;;  %v351_v7 = vmul.f32 %v1901_v63, %v278_v5  ;;  %vm298_vm5 = vweird.f32 %v227_v2 }
 0x236   :  { %v305_v32 = vor.u32 1.1754944e-38, %v304_v25  ;;  %vm303_vm7 = vcmp.eq.f32.partialorder %v302_v28, 8.507059e+37 }
 0x237   :  { %v282_v10 = vmul.f32 %v1695_v0, %v281_v6  ;;  %1595 = vmatmul.msk.f32.gmra.mxu1 %vm164_vm1, %v351_v7 }
 0x239   :  { %v283_v13 = vadd.f32 %v1695_v0, %v282_v10 }
 0x23a   :  { %v1697_v15 = vpop.eup %1696 }
 0x23b   :  { %v294_v63 = vmul.f32 %v1697_v15, %v227_v2  ;;  %v230_v17 = vpop.xlane.xlu0 %229  ;;  %v287_v18 = vsel %vm286_vm2, %v1695_v0, %v283_v13  ;;  %vm299_vm4 = vweird.f32 %v1697_v15  ;;  %v1997_v13 = vpop.f32.mrf.mxu2 }
 0x23c   :  { %1698 = vrcp.f32 %v230_v17  ;;  %v292_v20 = vsel %vm289_vm3, %v291_v16, %v287_v18  ;;  %vm300_vm6 = vmor %vm298_vm5, %vm299_vm4  ;;  %v318_v39 = vand.u32 2147483648, %v230_v17  ;;  %v316_v41 = vand.u32 2147483647, %v230_v17 }
 0x23d   :  { %v295_v21 = vsub.f32 1.0, %v294_v63  ;;  %v352_v23 = vmul.f32 %v1905_v4, %v292_v20  ;;  %vm312_vm9 = vweird.f32 %v230_v17 }
 0x23e   :  { %v319_v45 = vor.u32 1.1754944e-38, %v318_v39  ;;  %vm317_vm11 = vcmp.eq.f32.partialorder %v316_v41, 8.507059e+37 }
 0x23f   :  { %v296_v27 = vmul.f32 %v1697_v15, %v295_v21  ;;  %1596 = vmatmul.msk.f32.gmra.mxu1 %vm164_vm1, %v352_v23 }
 0x241   :  { %v297_v30 = vadd.f32 %v1697_v15, %v296_v27 }
 0x242   :  { %v1699_v31 = vpop.eup %1698 }
 0x243   :  { %v308_v4 = vmul.f32 %v1699_v31, %v230_v17  ;;  %v233_v33 = vpop.xlane.xlu1 %232  ;;  %v301_v34 = vsel %vm300_vm6, %v1697_v15, %v297_v30  ;;  %vm313_vm8 = vweird.f32 %v1699_v31  ;;  %v469_v16 = vpop.f32.mrf.mxu2  ;;  %v51_v30 = vld [vmem:[%s2392_s2 + $0x18] sm:$0xff]  ;;  %vm513_vm6 = vcmask 130048  }
 0x244   :  { %1700 = vrcp.f32 %v233_v33  ;;  %v306_v36 = vsel %vm303_vm7, %v305_v32, %v301_v34  ;;  %vm314_vm10 = vmor %vm312_vm9, %vm313_vm8  ;;  %v332_v52 = vand.u32 2147483648, %v233_v33  ;;  %v330_v54 = vand.u32 2147483647, %v233_v33  ;;  %569 = vmatpush.msra.mxu3 %v51_v30  ;;  %v49_v32 = vld [vmem:[%s2392_s2 + $0x8] sm:$0xff] }
 0x245   :  { %v309_v37 = vsub.f32 1.0, %v308_v4  ;;  %v353_v38 = vmul.f32 %v1909_v9, %v306_v36  ;;  %vm326_vm13 = vweird.f32 %v233_v33  ;;  %v48_v4 = vld [vmem:[%s2392_s2] sm:$0xff]  ;;  %vm516_vm7 = vcmask 195584  }
 0x246   :  { %v333_v57 = vor.u32 1.1754944e-38, %v332_v52  ;;  %vm331_vm15 = vcmp.eq.f32.partialorder %v330_v54, 8.507059e+37  ;;  %vm550_vm8 = vcmask 261120  }
 0x247   :  { %v310_v40 = vmul.f32 %v1699_v31, %v309_v37  ;;  %1597 = vmatmul.msk.f32.gmra.mxu1 %vm164_vm1, %v353_v38 }
 0x249   :  { %v311_v43 = vadd.f32 %v1699_v31, %v310_v40 }
 0x24a   :  { %v1701_v44 = vpop.eup %1700 }
 0x24b   :  { %v322_v9 = vmul.f32 %v1701_v44, %v233_v33  ;;  %v236_v46 = vpop.xlane.xlu2 %235  ;;  %v315_v47 = vsel %vm314_vm10, %v1699_v31, %v311_v43  ;;  %vm327_vm12 = vweird.f32 %v1701_v44  ;;  %v472_v17 = vpop.f32.mrf.mxu2  ;;  %v50_v31 = vld [vmem:[%s2392_s2 + $0x10] sm:$0xff] }
 0x24c   :  { %1702 = vrcp.f32 %v236_v46  ;;  %v320_v49 = vsel %vm317_vm11, %v319_v45, %v315_v47  ;;  %vm328_vm14 = vmor %vm326_vm13, %vm327_vm12  ;;  %v346_v58 = vand.u32 2147483648, %v236_v46  ;;  %v344_v2 = vand.u32 2147483647, %v236_v46  ;;  %570 = vmatpush.msra.mxu3 %v50_v31  ;;  %v2034_v47 = vld [vmem:[%s2392_s2 + $0x80] ss:$0 sm:$0xff] }
 0x24d   :  { %v323_v50 = vsub.f32 1.0, %v322_v9  ;;  %v354_v51 = vmul.f32 %v1913_v14, %v320_v49  ;;  %vm340_vm3 = vweird.f32 %v236_v46 }
 0x24e   :  { %v347_v5 = vor.u32 1.1754944e-38, %v346_v58  ;;  %vm345_vm5 = vcmp.eq.f32.partialorder %v344_v2, 8.507059e+37  ;;  %571 = vmatpush.msra.mxu3 %v49_v32 }
 0x24f   :  { %v324_v53 = vmul.f32 %v1701_v44, %v323_v50  ;;  %1598 = vmatmul.msk.f32.gmra.mxu1 %vm164_vm1, %v354_v51 }
 0x250   :  { %572 = vmatpush.msra.mxu3 %v48_v4 }
 0x251   :  { %v325_v55 = vadd.f32 %v1701_v44, %v324_v53 }
 0x252   :  { %v1703_v56 = vpop.eup %1702 }
 0x253   :  { %v336_v59 = vmul.f32 %v1703_v56, %v236_v46  ;;  %v329_v60 = vsel %vm328_vm14, %v1701_v44, %v325_v55  ;;  %vm341_vm2 = vweird.f32 %v1703_v56  ;;  %v475_v20 = vpop.f32.mrf.mxu2 }
 0x254   :  { %v334_v61 = vsel %vm331_vm15, %v333_v57, %v329_v60  ;;  %vm342_vm4 = vmor %vm340_vm3, %vm341_vm2 }
 0x255   :  { %v337_v0 = vsub.f32 1.0, %v336_v59  ;;  %v355_v1 = vmul.f32 %v1917_v19, %v334_v61 }
 0x257   :  { %v338_v14 = vmul.f32 %v1703_v56, %v337_v0  ;;  %1599 = vmatmul.msk.f32.gmra.mxu1 %vm164_vm1, %v355_v1 }
 0x259   :  { %v339_v3 = vadd.f32 %v1703_v56, %v338_v14 }
 0x25b   :  { %v343_v6 = vsel %vm342_vm4, %v1703_v56, %v339_v3  ;;  %v478_v23 = vpop.f32.mrf.mxu2 }
 0x25c   :  { %v348_v7 = vsel %vm345_vm5, %v347_v5, %v343_v6  ;;  %v1801_v6 = vmov 32.0  }
 0x25d   :  { %v356_v8 = vmul.f32 %v1921_v22, %v348_v7  ;;  %1704 = vrcp.f32 %v1801_v6  ;;  %v63_v6 = vld [vmem:[%s2392_s2 + $0x78] sm:$0xff] }
 0x25f   :  { %1600 = vmatmul.msk.f32.gmra.mxu1 %vm164_vm1, %v356_v8 }
 0x263   :  { %v1705_v7 = vpop.eup %1704 }
 0x264   :  { %v589_v8 = vmul.f32 32.0, %v1705_v7  ;;  %vm593_vm9 = vweird.f32 %v1705_v7 }
 0x2a4   :  { %v398_v10 = vpop.f32.mrf.mxu1 }
 0x2a7   :  { %v481_v27 = vpop.f32.mrf.mxu2 }
 0x2ac   :  { %v401_v19 = vpop.f32.mrf.mxu1 }
 0x2af   :  { %v484_v28 = vpop.f32.mrf.mxu2 }
 0x2b4   :  { %v404_v15 = vpop.f32.mrf.mxu1 }
 0x2b5   :  { %489 = vrot.lane.b32.xlu0 %v404_v15, %s1798_s5 }
 0x2bc   :  { %v407_v63 = vpop.f32.mrf.mxu1 }
 0x2bd   :  { %491 = vrot.lane.b32.xlu0 %v407_v63, %s1798_s5 }
 0x2c4   :  { %v410_v18 = vpop.f32.mrf.mxu1 }
 0x2c5   :  { %497 = vrot.lane.b32.xlu1 %v410_v18, %s1799_s6 }
 0x2cc   :  { %v413_v22 = vpop.f32.mrf.mxu1 }
 0x2cd   :  { %499 = vrot.lane.b32.xlu1 %v413_v22, %s1799_s6 }
 0x2d4   :  { %v416_v21 = vpop.f32.mrf.mxu1 }
 0x2d5   :  { %529 = vrot.lane.b32.xlu1 %v475_v20, %s1799_s6  ;;  %505 = vrot.lane.b32.xlu2 %v416_v21, %s1800_s7 }
 0x2dc   :  { %v419_v25 = vpop.f32.mrf.mxu1 }
 0x2dd   :  { %531 = vrot.lane.b32.xlu1 %v478_v23, %s1799_s6  ;;  %521 = vrot.lane.b32.xlu2 %v469_v16, %s1798_s5 }
 0x2de   :  { %507 = vrot.lane.b32.xlu0 %v419_v25, %s1800_s7 }
 0x2e5   :  { %523 = vrot.lane.b32.xlu2 %v472_v17, %s1798_s5 }
 0x2e6   :  { %537 = vrot.lane.b32.xlu0 %v481_v27, %s1800_s7  ;;  %v1802_v27 = vmov 31.0  }
 0x2e7   :  { %1706 = vrcp.f32 %v1802_v27  ;;  %v59_v27 = vld [vmem:[%s2392_s2 + $0x58] sm:$0xff] }
 0x2ee   :  { %539 = vrot.lane.b32.xlu0 %v484_v28, %s1800_s7  ;;  %v1707_v28 = vpop.eup %1706 }
 0x2ef   :  { %v608_v30 = vmul.f32 31.0, %v1707_v28  ;;  %vm612_vm10 = vweird.f32 %v1707_v28 }
 0x2f1   :  { %v609_v31 = vsub.f32 1.0, %v608_v30 }
 0x2f3   :  { %v610_v32 = vmul.f32 %v1707_v28, %v609_v31 }
 0x2f5   :  { %v611_v4 = vadd.f32 %v1707_v28, %v610_v32 }
 0x327   :  { %v490_v33 = vpop.permute.xlu0 %489 }
 0x328   :  { %v511_v34 = vsel %vm90_vm0, %v398_v10, %v490_v33  ;;  %v590_v10 = vsub.f32 1.0, %v589_v8  ;;  %v2061_v33 = vsel %vm612_vm10, %v1707_v28, %v611_v4 }
 0x32f   :  { %v506_v37 = vpop.permute.xlu2 %505  ;;  %v492_v40 = vpop.permute.xlu0 %491 }
 0x330   :  { %v512_v43 = vsel %vm90_vm0, %v401_v19, %v492_v40  ;;  %v54_v40 = vld [vmem:[%s2392_s2 + $0x30] sm:$0xff] }
 0x337   :  { %v498_v36 = vpop.permute.xlu1 %497  ;;  %v522_v46 = vpop.permute.xlu2 %521 }
 0x338   :  { %v514_v38 = vsel %vm513_vm6, %v511_v34, %v498_v36  ;;  %v543_v51 = vsel %vm90_vm0, %v463_v11, %v522_v46  ;;  %v591_v11 = vmul.f32 %v1705_v7, %v590_v10 }
 0x339   :  { %v517_v39 = vsel %vm516_vm7, %v514_v38, %v506_v37  ;;  %v55_v37 = vld [vmem:[%s2392_s2 + $0x38] sm:$0xff] }
 0x33a   :  { %1609 = vmatmul.msk.f32.vlgmr.msra.gmra.mxu3 %vm550_vm8, %v517_v39  ;;  %v592_v19 = vadd.f32 %v1705_v7, %v591_v11 }
 0x33b   :  { %697 = vmatpush.msrb.mxu3 %v55_v37 }
 0x33d   :  { %698 = vmatpush.msrb.mxu3 %v54_v40 }
 0x33f   :  { %v500_v41 = vpop.permute.xlu1 %499  ;;  %v524_v59 = vpop.permute.xlu2 %523 }
 0x340   :  { %v515_v44 = vsel %vm513_vm6, %v512_v43, %v500_v41  ;;  %v544_v0 = vsel %vm90_vm0, %v1997_v13, %v524_v59  ;;  %v2047_v13 = vsel %vm593_vm9, %v1705_v7, %v592_v19  ;;  %v53_v43 = vld [vmem:[%s2392_s2 + $0x28] sm:$0xff]  ;;  %v62_v7 = vld [vmem:[%s2392_s2 + $0x70] sm:$0xff] }
 0x341   :  { %699 = vmatpush.msrb.mxu3 %v53_v43 }
 0x347   :  { %v530_v49 = vpop.permute.xlu1 %529 }
 0x348   :  { %v545_v53 = vsel %vm513_vm6, %v543_v51, %v530_v49 }
 0x34f   :  { %v532_v60 = vpop.permute.xlu1 %531 }
 0x350   :  { %v508_v45 = vpop.permute.xlu0 %507  ;;  %v546_v58 = vsel %vm513_vm6, %v544_v0, %v532_v60 }
 0x351   :  { %v518_v9 = vsel %vm516_vm7, %v515_v44, %v508_v45  ;;  %v52_v44 = vld [vmem:[%s2392_s2 + $0x20] sm:$0xff] }
 0x352   :  { %1610 = vmatmul.msk.f32.gmra.mxu3 %vm550_vm8, %v518_v9 }
 0x353   :  { %700 = vmatpush.msrb.mxu3 %v52_v44 }
 0x355   :  { %728 = vmatpush.msra.mxu3 %v63_v6 }
 0x357   :  { %729 = vmatpush.msra.mxu3 %v62_v7 }
 0x358   :  { %v538_v50 = vpop.permute.xlu0 %537 }
 0x359   :  { %v547_v55 = vsel %vm516_vm7, %v545_v53, %v538_v50 }
 0x360   :  { %v540_v61 = vpop.permute.xlu0 %539 }
 0x361   :  { %v548_v2 = vsel %vm516_vm7, %v546_v58, %v540_v61 }
 0x3bd   :  { %v574_v52 = vpop.f32.mrf.mxu3 }
 0x3be   :  { %v575_v54 = vadd.f32 %v2034_v47, %v574_v52 }
 0x3c0   :  { %v580_v56 = vadd.f32 %v575_v54, %v547_v55 }
 0x3c2   :  { %v582_v57 = vsel %vm550_vm8, %v580_v56, 0.0 }
 0x3c3   :  { %583 = vadd.xlane.f32.xlu2 %v582_v57 }
 0x3d5   :  { %v577_v1 = vpop.f32.mrf.mxu3 }
 0x3d6   :  { %v578_v14 = vadd.f32 %v2034_v47, %v577_v1 }
 0x3d8   :  { %v581_v3 = vadd.f32 %v578_v14, %v548_v2  ;;  %v670_v2 = vstv %s2077_s27  ;;  %s2132_s27 = sld [smem:[#allocation2 + $0x3]] }
 0x3da   :  { %v585_v5 = vsel %vm550_vm8, %v581_v3, 0.0 }
 0x3db   :  { %586 = vadd.xlane.f32.xlu1 %v585_v5 }
 0x3f4   :  { %711 = vrot.lane.b32.xlu1 %v2034_v47, %s1803_s16  ;;  %v58_v47 = vld [vmem:[%s2392_s2 + $0x50] sm:$0xff] }
 0x436   :  { %v584_v15 = vpop.xlane.xlu2 %583 }
 0x437   :  { %v595_v16 = vmul.f32 %v2047_v13, %v584_v15  ;;  %v61_v15 = vld [vmem:[%s2392_s2 + $0x68] sm:$0xff] }
 0x438   :  { %730 = vmatpush.msra.mxu3 %v61_v15 }
 0x439   :  { %v2050_v63 = vsub.f32 %v580_v56, %v595_v16 }
 0x43b   :  { %v599_v17 = vmul.f32 %v2050_v63, %v2050_v63  ;;  %v671_v11 = vmul.f32 %v670_v2, %v2050_v63 }
 0x43d   :  { %v601_v18 = vsel %vm550_vm8, %v599_v17, 0.0 }
 0x43e   :  { %602 = vadd.xlane.f32.xlu0 %v601_v18  ;;  %v675_v18 = vstv %s2079_s28 }
 0x44e   :  { %v587_v22 = vpop.xlane.xlu1 %586 }
 0x44f   :  { %v596_v20 = vmul.f32 %v2047_v13, %v587_v22 }
 0x451   :  { %v2056_v21 = vsub.f32 %v581_v3, %v596_v20  ;;  %v60_v20 = vld [vmem:[%s2392_s2 + $0x60] sm:$0xff] }
 0x452   :  { %731 = vmatpush.msra.mxu3 %v60_v20 }
 0x453   :  { %v600_v23 = vmul.f32 %v2056_v21, %v2056_v21 }
 0x454   :  { %732 = vmatpush.msra.mxu3 %v59_v27 }
 0x455   :  { %v604_v25 = vsel %vm550_vm8, %v600_v23, 0.0 }
 0x456   :  { %605 = vadd.xlane.f32.xlu2 %v604_v25  ;;  %733 = vmatpush.msra.mxu3 %v58_v47 }
 0x4b1   :  { %v603_v34 = vpop.xlane.xlu0 %602 }
 0x4b2   :  { %v614_v36 = vmul.f32 %v2061_v33, %v603_v34 }
 0x4b4   :  { %1708 = vrsqrt.f32 %v614_v36  ;;  %vm623_vm11 = vcmp.eq.f32.partialorder %v614_v36, inf  ;;  %v626_v50 = vand.u32 2147483648, %v614_v36  ;;  %vm625_vm12 = vcmp.eq.f32.partialorder %v614_v36, 0.0 }
 0x4ba   :  { %v1709_v38 = vpop.eup %1708 }
 0x4bb   :  { %v617_v39 = vmul.f32 %v1709_v38, %v614_v36 }
 0x4bd   :  { %v618_v41 = vmul.f32 %v1709_v38, %v617_v39 }
 0x4bf   :  { %v619_v45 = vmul.f32 0.5, %v618_v41  ;;  %v672_v41 = vmul.f32 %v670_v2, %v2056_v21  ;;  %v56_v21 = vld [vmem:[%s2392_s2 + $0x40] sm:$0xff] }
 0x4c1   :  { %v620_v9 = vsub.f32 1.5, %v619_v45 }
 0x4c3   :  { %v621_v46 = vmul.f32 %v1709_v38, %v620_v9 }
 0x4c5   :  { %v622_v49 = vmul.f32 %v621_v46, %v614_v36  ;;  %v57_v46 = vld [vmem:[%s2392_s2 + $0x48] sm:$0xff] }
 0x4c6   :  { %734 = vmatpush.msra.mxu3 %v57_v46 }
 0x4c7   :  { %v624_v51 = vsel %vm623_vm11, %v614_v36, %v622_v49  ;;  %v1669_v49 = vld [vmem:[%s2392_s2 + $0x81] ss:$0 sm:$0xff] }
 0x4c8   :  { %v627_v52 = vsel %vm625_vm12, %v626_v50, %v624_v51  ;;  %735 = vmatpush.msra.mxu3 %v56_v21 }
 0x4c9   :  { %v606_v53 = vpop.xlane.xlu2 %605  ;;  %v640_v54 = vadd.f32 1e-12, %v627_v52 }
 0x4ca   :  { %v615_v55 = vmul.f32 %v2061_v33, %v606_v53 }
 0x4cb   :  { %1710 = vrcp.f32 %v640_v54  ;;  %v653_v1 = vand.u32 2147483648, %v640_v54  ;;  %v651_v14 = vand.u32 2147483647, %v640_v54  ;;  %vm647_vm14 = vweird.f32 %v640_v54 }
 0x4cc   :  { %1712 = vrsqrt.f32 %v615_v55  ;;  %vm635_vm3 = vcmp.eq.f32.partialorder %v615_v55, inf  ;;  %v638_v25 = vand.u32 2147483648, %v615_v55  ;;  %vm637_vm4 = vcmp.eq.f32.partialorder %v615_v55, 0.0 }
 0x4cd   :  { %v654_v10 = vor.u32 1.1754944e-38, %v653_v1  ;;  %vm652_vm2 = vcmp.eq.f32.partialorder %v651_v14, 8.507059e+37 }
 0x4d1   :  { %v1711_v56 = vpop.eup %1710 }
 0x4d2   :  { %v1713_v57 = vpop.eup %1712  ;;  %v643_v59 = vmul.f32 %v1711_v56, %v640_v54  ;;  %vm648_vm13 = vweird.f32 %v1711_v56 }
 0x4d3   :  { %v629_v60 = vmul.f32 %v1713_v57, %v615_v55  ;;  %vm649_vm15 = vmor %vm647_vm14, %vm648_vm13 }
 0x4d4   :  { %v644_v61 = vsub.f32 1.0, %v643_v59 }
 0x4d5   :  { %v630_v0 = vmul.f32 %v1713_v57, %v629_v60 }
 0x4d6   :  { %v645_v58 = vmul.f32 %v1711_v56, %v644_v61 }
 0x4d7   :  { %v631_v3 = vmul.f32 0.5, %v630_v0 }
 0x4d8   :  { %v646_v5 = vadd.f32 %v1711_v56, %v645_v58 }
 0x4d9   :  { %v632_v8 = vsub.f32 1.5, %v631_v3 }
 0x4da   :  { %v650_v19 = vsel %vm649_vm15, %v1711_v56, %v646_v5  ;;  %v712_v56 = vpop.permute.xlu1 %711 }
 0x4db   :  { %v633_v16 = vmul.f32 %v1713_v57, %v632_v8  ;;  %v655_v17 = vsel %vm652_vm2, %v654_v10, %v650_v19 }
 0x4dc   :  { %v673_v22 = vmul.f32 %v671_v11, %v655_v17 }
 0x4dd   :  { %v634_v23 = vmul.f32 %v633_v16, %v615_v55 }
 0x4de   :  { %v676_v63 = vadd.f32 %v675_v18, %v673_v22 }
 0x4df   :  { %v636_v28 = vsel %vm635_vm3, %v615_v55, %v634_v23 }
 0x4e0   :  { %1611 = vmatmul.msk.f32.vlgmr.msrb.gmra.mxu3 %vm550_vm8, %v676_v63  ;;  %v639_v30 = vsel %vm637_vm4, %v638_v25, %v636_v28 }
 0x4e1   :  { %v641_v31 = vadd.f32 1e-12, %v639_v30 }
 0x4e3   :  { %1714 = vrcp.f32 %v641_v31  ;;  %v667_v36 = vand.u32 2147483648, %v641_v31  ;;  %v665_v38 = vand.u32 2147483647, %v641_v31  ;;  %vm661_vm9 = vweird.f32 %v641_v31 }
 0x4e5   :  { %v668_v40 = vor.u32 1.1754944e-38, %v667_v36  ;;  %vm666_vm11 = vcmp.eq.f32.partialorder %v665_v38, 8.507059e+37 }
 0x4e9   :  { %v1715_v32 = vpop.eup %1714 }
 0x4ea   :  { %v657_v4 = vmul.f32 %v1715_v32, %v641_v31  ;;  %vm662_vm5 = vweird.f32 %v1715_v32 }
 0x4eb   :  { %vm663_vm10 = vmor %vm661_vm9, %vm662_vm5 }
 0x4ec   :  { %v658_v34 = vsub.f32 1.0, %v657_v4 }
 0x4ee   :  { %v659_v37 = vmul.f32 %v1715_v32, %v658_v34 }
 0x4f0   :  { %v660_v39 = vadd.f32 %v1715_v32, %v659_v37 }
 0x4f2   :  { %v664_v43 = vsel %vm663_vm10, %v1715_v32, %v660_v39 }
 0x4f3   :  { %v669_v44 = vsel %vm666_vm11, %v668_v40, %v664_v43 }
 0x4f4   :  { %v674_v45 = vmul.f32 %v672_v41, %v669_v44 }
 0x4f6   :  { %v677_v9 = vadd.f32 %v675_v18, %v674_v45 }
 0x4f8   :  { %1612 = vmatmul.msk.f32.gmra.mxu3 %vm550_vm8, %v677_v9 }
 0x563   :  { %v702_v50 = vpop.f32.mrf.mxu3 }
 0x564   :  { %v703_v51 = vadd.f32 %v1669_v49, %v702_v50 }
 0x566   :  { %v708_v52 = vmax.f32 %v703_v51, 0.0 }
 0x568   :  { %1613 = vmatmul.msk.f32.vlgmr.msra.gmra.mxu3 %vm164_vm1, %v708_v52 }
 0x57b   :  { %v705_v53 = vpop.f32.mrf.mxu3 }
 0x57c   :  { %v706_v54 = vadd.f32 %v1669_v49, %v705_v53 }
 0x57e   :  { %v709_v55 = vmax.f32 %v706_v54, 0.0  ;;  %v824_v54 = vstv %s2132_s27 }
 0x580   :  { %1614 = vmatmul.msk.f32.gmra.mxu3 %vm164_vm1, %v709_v55 }
 0x5eb   :  { %v737_v57 = vpop.f32.mrf.mxu3 }
 0x5ec   :  { %v738_v59 = vadd.f32 %v737_v57, %v712_v56 }
 0x5ee   :  { %v743_v60 = vadd.f32 %v738_v59, %v676_v63 }
 0x5f0   :  { %v745_v61 = vsel %vm550_vm8, %v743_v60, 0.0 }
 0x5f1   :  { %746 = vadd.xlane.f32.xlu2 %v745_v61 }
 0x603   :  { %v740_v0 = vpop.f32.mrf.mxu3 }
 0x604   :  { %v741_v1 = vadd.f32 %v740_v0, %v712_v56 }
 0x606   :  { %v744_v58 = vadd.f32 %v741_v1, %v677_v9  ;;  %v819_v9 = vstv %s2130_s26 }
 0x608   :  { %v748_v14 = vsel %vm550_vm8, %v744_v58, 0.0 }
 0x609   :  { %749 = vadd.xlane.f32.xlu0 %v748_v14 }
 0x664   :  { %v747_v2 = vpop.xlane.xlu2 %746 }
 0x665   :  { %v751_v3 = vmul.f32 %v747_v2, %v2047_v13 }
 0x667   :  { %v753_v5 = vsub.f32 %v743_v60, %v751_v3 }
 0x669   :  { %v755_v6 = vmul.f32 %v753_v5, %v753_v5  ;;  %v820_v50 = vmul.f32 %v819_v9, %v753_v5 }
 0x66b   :  { %v757_v7 = vsel %vm550_vm8, %v755_v6, 0.0 }
 0x66c   :  { %758 = vadd.xlane.f32.xlu2 %v757_v7 }
 0x67c   :  { %v750_v8 = vpop.xlane.xlu0 %749 }
 0x67d   :  { %v752_v10 = vmul.f32 %v750_v8, %v2047_v13 }
 0x67f   :  { %v2123_v11 = vsub.f32 %v744_v58, %v752_v10 }
 0x681   :  { %v756_v19 = vmul.f32 %v2123_v11, %v2123_v11  ;;  %v821_v8 = vmul.f32 %v819_v9, %v2123_v11 }
 0x683   :  { %v760_v15 = vsel %vm550_vm8, %v756_v19, 0.0 }
 0x684   :  { %761 = vadd.xlane.f32.xlu0 %v760_v15 }
 0x6df   :  { %v759_v16 = vpop.xlane.xlu2 %758 }
 0x6e0   :  { %v763_v17 = vmul.f32 %v759_v16, %v2061_v33 }
 0x6e2   :  { %1716 = vrsqrt.f32 %v763_v17  ;;  %vm772_vm12 = vcmp.eq.f32.partialorder %v763_v17, inf  ;;  %v775_v28 = vand.u32 2147483648, %v763_v17  ;;  %vm774_vm13 = vcmp.eq.f32.partialorder %v763_v17, 0.0 }
 0x6e8   :  { %v1717_v18 = vpop.eup %1716 }
 0x6e9   :  { %v766_v22 = vmul.f32 %v1717_v18, %v763_v17 }
 0x6eb   :  { %v767_v20 = vmul.f32 %v1717_v18, %v766_v22 }
 0x6ed   :  { %v768_v23 = vmul.f32 0.5, %v767_v20 }
 0x6ef   :  { %v769_v25 = vsub.f32 1.5, %v768_v23 }
 0x6f1   :  { %v770_v63 = vmul.f32 %v1717_v18, %v769_v25 }
 0x6f3   :  { %v771_v27 = vmul.f32 %v770_v63, %v763_v17 }
 0x6f5   :  { %v773_v30 = vsel %vm772_vm12, %v763_v17, %v771_v27 }
 0x6f6   :  { %v776_v31 = vsel %vm774_vm13, %v775_v28, %v773_v30  ;;  %v1774_v30 = vld [vmem:[%s2391_s1 + $0x10] sm:$0xff] }
 0x6f7   :  { %v789_v32 = vadd.f32 1e-12, %v776_v31  ;;  %v762_v4 = vpop.xlane.xlu0 %761 }
 0x6f8   :  { %v764_v34 = vmul.f32 %v762_v4, %v2061_v33 }
 0x6f9   :  { %1718 = vrcp.f32 %v789_v32  ;;  %v802_v43 = vand.u32 2147483648, %v789_v32  ;;  %v800_v45 = vand.u32 2147483647, %v789_v32  ;;  %vm796_vm15 = vweird.f32 %v789_v32 }
 0x6fa   :  { %1720 = vrsqrt.f32 %v764_v34  ;;  %vm784_vm4 = vcmp.eq.f32.partialorder %v764_v34, inf  ;;  %v787_v57 = vand.u32 2147483648, %v764_v34  ;;  %vm786_vm5 = vcmp.eq.f32.partialorder %v764_v34, 0.0 }
 0x6fb   :  { %v803_v49 = vor.u32 1.1754944e-38, %v802_v43  ;;  %vm801_vm3 = vcmp.eq.f32.partialorder %v800_v45, 8.507059e+37 }
 0x6ff   :  { %v1719_v36 = vpop.eup %1718 }
 0x700   :  { %v1721_v37 = vpop.eup %1720  ;;  %v792_v38 = vmul.f32 %v1719_v36, %v789_v32  ;;  %vm797_vm14 = vweird.f32 %v1719_v36 }
 0x701   :  { %v778_v39 = vmul.f32 %v1721_v37, %v764_v34  ;;  %vm798_vm2 = vmor %vm796_vm15, %vm797_vm14 }
 0x702   :  { %v793_v40 = vsub.f32 1.0, %v792_v38 }
 0x703   :  { %v779_v41 = vmul.f32 %v1721_v37, %v778_v39 }
 0x704   :  { %v794_v44 = vmul.f32 %v1719_v36, %v793_v40 }
 0x705   :  { %v780_v47 = vmul.f32 0.5, %v779_v41  ;;  %v1776_v41 = vld [vmem:[%s2391_s1 + $0x20] sm:$0xff] }
 0x706   :  { %v795_v46 = vadd.f32 %v1719_v36, %v794_v44 }
 0x707   :  { %v781_v21 = vsub.f32 1.5, %v780_v47  ;;  %v1777_v47 = vld [vmem:[%s2391_s1 + $0x28] sm:$0xff] }
 0x708   :  { %v799_v51 = vsel %vm798_vm2, %v1719_v36, %v795_v46  ;;  %v1775_v36 = vld [vmem:[%s2391_s1 + $0x18] sm:$0xff] }
 0x709   :  { %v782_v52 = vmul.f32 %v1721_v37, %v781_v21  ;;  %v804_v53 = vsel %vm801_vm3, %v803_v49, %v799_v51  ;;  %v1778_v51 = vld [vmem:[%s2391_s1 + $0x30] sm:$0xff] }
 0x70a   :  { %v822_v55 = vmul.f32 %v820_v50, %v804_v53 }
 0x70b   :  { %v783_v56 = vmul.f32 %v782_v52, %v764_v34 }
 0x70c   :  { %v825_v59 = vadd.f32 %v824_v54, %v822_v55 }
 0x70d   :  { %v785_v60 = vsel %vm784_vm4, %v764_v34, %v783_v56  ;;  %v1779_v56 = vld [vmem:[%s2391_s1 + $0x38] sm:$0xff] }
 0x70e   :  { %v788_v61 = vsel %vm786_vm5, %v787_v57, %v785_v60  ;;  %863 = vrot.lane.b32.xlu2 %v825_v59, %s1795_s21 }
 0x70f   :  { %v790_v0 = vadd.f32 1e-12, %v788_v61 }
 0x711   :  { %1722 = vrcp.f32 %v790_v0  ;;  %v816_v2 = vand.u32 2147483648, %v790_v0  ;;  %v814_v5 = vand.u32 2147483647, %v790_v0  ;;  %vm810_vm10 = vweird.f32 %v790_v0 }
 0x713   :  { %v817_v7 = vor.u32 1.1754944e-38, %v816_v2  ;;  %vm815_vm12 = vcmp.eq.f32.partialorder %v814_v5, 8.507059e+37 }
 0x717   :  { %v1723_v1 = vpop.eup %1722 }
 0x718   :  { %v806_v58 = vmul.f32 %v1723_v1, %v790_v0  ;;  %vm811_vm9 = vweird.f32 %v1723_v1 }
 0x719   :  { %vm812_vm11 = vmor %vm810_vm10, %vm811_vm9 }
 0x71a   :  { %v807_v14 = vsub.f32 1.0, %v806_v58 }
 0x71c   :  { %v808_v3 = vmul.f32 %v1723_v1, %v807_v14 }
 0x71e   :  { %v809_v6 = vadd.f32 %v1723_v1, %v808_v3 }
 0x720   :  { %v813_v10 = vsel %vm812_vm11, %v1723_v1, %v809_v6 }
 0x721   :  { %v818_v19 = vsel %vm815_vm12, %v817_v7, %v813_v10 }
 0x722   :  { %v823_v15 = vmul.f32 %v821_v8, %v818_v19 }
 0x724   :  { %v826_v16 = vadd.f32 %v824_v54, %v823_v15 }
 0x726   :  { %859 = vrot.lane.b32.xlu1 %v826_v16, %s1796_s22  ;;  %865 = vrot.lane.b32.xlu0 %v826_v16, %s1795_s21 }
 0x72e   :  { %853 = vrot.lane.b32.xlu0 %v826_v16, %s1797_s23  ;;  %857 = vrot.lane.b32.xlu1 %v825_v59, %s1796_s22 }
 0x736   :  { %851 = vrot.lane.b32.xlu1 %v825_v59, %s1797_s23 }
 0x768   :  { %v864_v11 = vpop.permute.xlu2 %863 }
 0x798   :  { %v860_v17 = vpop.permute.xlu1 %859  ;;  %v866_v18 = vpop.permute.xlu0 %865 }
 0x799   :  { %1619 = vmatpush.xpose.msk.msrb.mxu3 %vm90_vm0, %v866_v18  ;;  %1166 = vmatpush.msrb.mxu1 %v866_v18 }
 0x79a   :  { %1207 = vmatpush.msrb.mxu2 %v866_v18 }
 0x79b   :  { %1167 = vmatpush.msrb.mxu1 %v864_v11 }
 0x79c   :  { %1208 = vmatpush.msrb.mxu2 %v864_v11 }
 0x79d   :  { %1620 = vmatpush.xpose.msk.msrb.mxu3 %vm90_vm0, %v864_v11  ;;  %1168 = vmatpush.msrb.mxu1 %v860_v17 }
 0x79e   :  { %1209 = vmatpush.msrb.mxu2 %v860_v17 }
 0x7a0   :  { %v858_v22 = vpop.permute.xlu1 %857  ;;  %v854_v20 = vpop.permute.xlu0 %853 }
 0x7a1   :  { %1621 = vmatpush.xpose.msk.msrb.mxu3 %vm90_vm0, %v860_v17  ;;  %1169 = vmatpush.msrb.mxu1 %v858_v22 }
 0x7a2   :  { %1210 = vmatpush.msrb.mxu2 %v858_v22 }
 0x7a3   :  { %1170 = vmatpush.msrb.mxu1 %v854_v20 }
 0x7a4   :  { %1211 = vmatpush.msrb.mxu2 %v854_v20 }
 0x7a5   :  { %1622 = vmatpush.xpose.msk.msrb.mxu3 %vm90_vm0, %v858_v22 }
 0x7a8   :  { %v852_v23 = vpop.permute.xlu1 %851 }
 0x7a9   :  { %1623 = vmatpush.xpose.msk.msrb.mxu3 %vm90_vm0, %v854_v20  ;;  %1171 = vmatpush.msrb.mxu1 %v852_v23 }
 0x7aa   :  { %1212 = vmatpush.msrb.mxu2 %v852_v23 }
 0x7ab   :  { %1172 = vmatpush.msrb.mxu1 %v826_v16 }
 0x7ac   :  { %1213 = vmatpush.msrb.mxu2 %v826_v16 }
 0x7ad   :  { %1624 = vmatpush.xpose.msk.msrb.mxu3 %vm90_vm0, %v852_v23  ;;  %1173 = vmatpush.msrb.mxu1 %v825_v59 }
 0x7ae   :  { %1214 = vmatpush.msrb.mxu2 %v825_v59 }
 0x7af   :  { %1643 = vmatmul.msk.f32.vlgmr.msrb.gmra.mxu2 %vm164_vm1, %v1928_v24 }
 0x7b1   :  { %1625 = vmatpush.xpose.msk.msrb.mxu3 %vm90_vm0, %v826_v16 }
 0x7b5   :  { %1626 = vmatpush.xpose.msk.msrb.mxu3 %vm90_vm0, %v825_v59 }
 0x7b7   :  { %1644 = vmatmul.msk.f32.gmra.mxu2 %vm164_vm1, %v1935_v26 }
 0x7b8   :  { %1627 = vmatmul.msk.f32.vlgmr.msrb.gmra.mxu3 %vm90_vm0, %v825_v59 }
 0x7bf   :  { %1645 = vmatmul.msk.f32.gmra.mxu2 %vm164_vm1, %v1942_v35  ;;  %v1772_v35 = vld [vmem:[%s2391_s1] sm:$0xff] }
 0x7c0   :  { %1628 = vmatmul.msk.f32.gmra.mxu3 %vm90_vm0, %v826_v16 }
 0x7c7   :  { %1646 = vmatmul.msk.f32.gmra.mxu2 %vm164_vm1, %v1951_v48 }
 0x7c8   :  { %1629 = vmatmul.msk.f32.gmra.mxu3 %vm90_vm0, %v852_v23 }
 0x7cf   :  { %1647 = vmatmul.msk.f32.gmra.mxu2 %vm164_vm1, %v1960_v62 }
 0x7d0   :  { %1630 = vmatmul.msk.f32.gmra.mxu3 %vm90_vm0, %v854_v20 }
 0x7d7   :  { %1648 = vmatmul.msk.f32.gmra.mxu2 %vm164_vm1, %v1969_v12 }
 0x7d8   :  { %1631 = vmatmul.msk.f32.gmra.mxu3 %vm90_vm0, %v858_v22 }
 0x7df   :  { %1649 = vmatmul.msk.f32.gmra.mxu2 %vm164_vm1, %v1978_v29 }
 0x7e0   :  { %1632 = vmatmul.msk.f32.gmra.mxu3 %vm90_vm0, %v860_v17 }
 0x7e7   :  { %1650 = vmatmul.msk.f32.gmra.mxu2 %vm164_vm1, %v1987_v42  ;;  %v1773_v42 = vld [vmem:[%s2391_s1 + $0x8] sm:$0xff] }
 0x7e8   :  { %1633 = vmatmul.msk.f32.gmra.mxu3 %vm90_vm0, %v864_v11 }
 0x7f0   :  { %1634 = vmatmul.msk.f32.gmra.mxu3 %vm90_vm0, %v866_v18 }
 0x83b   :  { %v902_v24 = vpop.f32.mrf.mxu3 }
 0x83c   :  { %v926_v26 = vmul.f32 0.35355338, %v902_v24 }
 0x83e   :  { %v934_v48 = vadd.f32 %v1772_v35, %v926_v26 }
 0x840   :  { %v942_v62 = vsel %vm164_vm1, %v934_v48, -inf }
 0x841   :  { %943 = vmax.xlane.f32.xlu2 %v942_v62 }
 0x843   :  { %v905_v12 = vpop.f32.mrf.mxu3 }
 0x844   :  { %v927_v29 = vmul.f32 0.35355338, %v905_v12 }
 0x846   :  { %v935_v25 = vadd.f32 %v1773_v42, %v927_v29 }
 0x848   :  { %v945_v63 = vsel %vm164_vm1, %v935_v25, -inf }
 0x849   :  { %946 = vmax.xlane.f32.xlu0 %v945_v63 }
 0x84b   :  { %v908_v27 = vpop.f32.mrf.mxu3 }
 0x84c   :  { %v928_v28 = vmul.f32 0.35355338, %v908_v27 }
 0x84e   :  { %v936_v31 = vadd.f32 %v1774_v30, %v928_v28 }
 0x850   :  { %v948_v32 = vsel %vm164_vm1, %v936_v31, -inf }
 0x851   :  { %949 = vmax.xlane.f32.xlu1 %v948_v32 }
 0x853   :  { %v911_v4 = vpop.f32.mrf.mxu3 }
 0x854   :  { %v929_v34 = vmul.f32 0.35355338, %v911_v4 }
 0x856   :  { %v937_v37 = vadd.f32 %v1775_v36, %v929_v34 }
 0x858   :  { %v951_v38 = vsel %vm164_vm1, %v937_v37, -inf }
 0x859   :  { %952 = vmax.xlane.f32.xlu2 %v951_v38 }
 0x85b   :  { %v914_v39 = vpop.f32.mrf.mxu3 }
 0x85c   :  { %v930_v40 = vmul.f32 0.35355338, %v914_v39 }
 0x85e   :  { %v938_v43 = vadd.f32 %v1776_v41, %v930_v40 }
 0x860   :  { %v954_v44 = vsel %vm164_vm1, %v938_v43, -inf }
 0x861   :  { %955 = vmax.xlane.f32.xlu0 %v954_v44 }
 0x863   :  { %v917_v45 = vpop.f32.mrf.mxu3 }
 0x864   :  { %v931_v9 = vmul.f32 0.35355338, %v917_v45 }
 0x866   :  { %v939_v46 = vadd.f32 %v1777_v47, %v931_v9 }
 0x868   :  { %v957_v21 = vsel %vm164_vm1, %v939_v46, -inf }
 0x869   :  { %958 = vmax.xlane.f32.xlu1 %v957_v21 }
 0x86b   :  { %v920_v49 = vpop.f32.mrf.mxu3 }
 0x86c   :  { %v932_v50 = vmul.f32 0.35355338, %v920_v49 }
 0x86e   :  { %v940_v52 = vadd.f32 %v1778_v51, %v932_v50 }
 0x870   :  { %v960_v53 = vsel %vm164_vm1, %v940_v52, -inf }
 0x871   :  { %961 = vmax.xlane.f32.xlu2 %v960_v53 }
 0x873   :  { %v923_v54 = vpop.f32.mrf.mxu3 }
 0x874   :  { %v933_v55 = vmul.f32 0.35355338, %v923_v54 }
 0x876   :  { %v941_v57 = vadd.f32 %v1779_v56, %v933_v55 }
 0x878   :  { %v963_v59 = vsel %vm164_vm1, %v941_v57, -inf }
 0x879   :  { %964 = vmax.xlane.f32.xlu1 %v963_v59 }
 0x8b4   :  { %v944_v60 = vpop.xlane.xlu2 %943 }
 0x8b5   :  { %v966_v61 = vsub.f32 %v934_v48, %v944_v60 }
 0x8b7   :  { %v974_v0 = vmul.f32 1.442695, %v966_v61 }
 0x8b9   :  { %1724 = vpow2.f32 %v974_v0 }
 0x8bc   :  { %v947_v1 = vpop.xlane.xlu0 %946 }
 0x8bd   :  { %v967_v58 = vsub.f32 %v935_v25, %v947_v1 }
 0x8bf   :  { %v2207_v14 = vpop.eup %1724  ;;  %v976_v2 = vmul.f32 1.442695, %v967_v58 }
 0x8c0   :  { %v990_v3 = vsel %vm164_vm1, %v2207_v14, 0.0 }
 0x8c1   :  { %1726 = vpow2.f32 %v976_v2  ;;  %991 = vadd.xlane.f32.xlu0 %v990_v3 }
 0x8c4   :  { %v950_v5 = vpop.xlane.xlu1 %949 }
 0x8c5   :  { %v968_v6 = vsub.f32 %v936_v31, %v950_v5 }
 0x8c7   :  { %v2211_v7 = vpop.eup %1726  ;;  %v978_v8 = vmul.f32 1.442695, %v968_v6 }
 0x8c8   :  { %v993_v10 = vsel %vm164_vm1, %v2211_v7, 0.0 }
 0x8c9   :  { %1728 = vpow2.f32 %v978_v8  ;;  %994 = vadd.xlane.f32.xlu2 %v993_v10 }
 0x8cc   :  { %v953_v19 = vpop.xlane.xlu2 %952 }
 0x8cd   :  { %v969_v15 = vsub.f32 %v937_v37, %v953_v19 }
 0x8cf   :  { %v2215_v16 = vpop.eup %1728  ;;  %v980_v17 = vmul.f32 1.442695, %v969_v15 }
 0x8d0   :  { %v996_v18 = vsel %vm164_vm1, %v2215_v16, 0.0 }
 0x8d1   :  { %1730 = vpow2.f32 %v980_v17  ;;  %997 = vadd.xlane.f32.xlu0 %v996_v18 }
 0x8d4   :  { %v956_v11 = vpop.xlane.xlu0 %955 }
 0x8d5   :  { %v970_v22 = vsub.f32 %v938_v43, %v956_v11 }
 0x8d7   :  { %v2219_v20 = vpop.eup %1730  ;;  %v982_v23 = vmul.f32 1.442695, %v970_v22 }
 0x8d8   :  { %v999_v24 = vsel %vm164_vm1, %v2219_v20, 0.0 }
 0x8d9   :  { %1732 = vpow2.f32 %v982_v23  ;;  %1000 = vadd.xlane.f32.xlu1 %v999_v24 }
 0x8dc   :  { %v959_v26 = vpop.xlane.xlu1 %958 }
 0x8dd   :  { %v971_v35 = vsub.f32 %v939_v46, %v959_v26 }
 0x8df   :  { %v2223_v48 = vpop.eup %1732  ;;  %v984_v62 = vmul.f32 1.442695, %v971_v35 }
 0x8e0   :  { %v1002_v12 = vsel %vm164_vm1, %v2223_v48, 0.0 }
 0x8e1   :  { %1734 = vpow2.f32 %v984_v62  ;;  %1003 = vadd.xlane.f32.xlu2 %v1002_v12 }
 0x8e4   :  { %v962_v29 = vpop.xlane.xlu2 %961 }
 0x8e5   :  { %v972_v42 = vsub.f32 %v940_v52, %v962_v29 }
 0x8e7   :  { %v2227_v25 = vpop.eup %1734  ;;  %v986_v63 = vmul.f32 1.442695, %v972_v42 }
 0x8e8   :  { %v1005_v27 = vsel %vm164_vm1, %v2227_v25, 0.0 }
 0x8e9   :  { %1736 = vpow2.f32 %v986_v63  ;;  %1006 = vadd.xlane.f32.xlu0 %v1005_v27 }
 0x8ec   :  { %v965_v28 = vpop.xlane.xlu1 %964 }
 0x8ed   :  { %v973_v30 = vsub.f32 %v941_v57, %v965_v28 }
 0x8ef   :  { %v2231_v31 = vpop.eup %1736  ;;  %v988_v32 = vmul.f32 1.442695, %v973_v30 }
 0x8f0   :  { %v1008_v4 = vsel %vm164_vm1, %v2231_v31, 0.0 }
 0x8f1   :  { %1738 = vpow2.f32 %v988_v32  ;;  %1009 = vadd.xlane.f32.xlu1 %v1008_v4 }
 0x8f7   :  { %v2235_v34 = vpop.eup %1738 }
 0x8f8   :  { %v1011_v36 = vsel %vm164_vm1, %v2235_v34, 0.0 }
 0x8f9   :  { %1012 = vadd.xlane.f32.xlu2 %v1011_v36 }
 0x934   :  { %v992_v37 = vpop.xlane.xlu0 %991 }
 0x935   :  { %1740 = vrcp.f32 %v992_v37  ;;  %v1025_v43 = vand.u32 2147483648, %v992_v37  ;;  %v1023_v45 = vand.u32 2147483647, %v992_v37  ;;  %vm1019_vm14 = vweird.f32 %v992_v37 }
 0x937   :  { %v1026_v46 = vor.u32 1.1754944e-38, %v1025_v43  ;;  %vm1024_vm2 = vcmp.eq.f32.partialorder %v1023_v45, 8.507059e+37 }
 0x93b   :  { %v1741_v38 = vpop.eup %1740 }
 0x93c   :  { %v1015_v39 = vmul.f32 %v1741_v38, %v992_v37  ;;  %v995_v40 = vpop.xlane.xlu2 %994  ;;  %vm1020_vm13 = vweird.f32 %v1741_v38 }
 0x93d   :  { %1742 = vrcp.f32 %v995_v40  ;;  %vm1021_vm15 = vmor %vm1019_vm14, %vm1020_vm13  ;;  %v1039_v54 = vand.u32 2147483648, %v995_v40  ;;  %v1037_v56 = vand.u32 2147483647, %v995_v40  ;;  %vm1033_vm4 = vweird.f32 %v995_v40 }
 0x93e   :  { %v1016_v41 = vsub.f32 1.0, %v1015_v39 }
 0x93f   :  { %v1040_v60 = vor.u32 1.1754944e-38, %v1039_v54  ;;  %vm1038_vm9 = vcmp.eq.f32.partialorder %v1037_v56, 8.507059e+37 }
 0x940   :  { %v1017_v44 = vmul.f32 %v1741_v38, %v1016_v41 }
 0x942   :  { %v1018_v9 = vadd.f32 %v1741_v38, %v1017_v44 }
 0x943   :  { %v1743_v47 = vpop.eup %1742 }
 0x944   :  { %v1029_v21 = vmul.f32 %v1743_v47, %v995_v40  ;;  %v998_v49 = vpop.xlane.xlu0 %997  ;;  %v1022_v50 = vsel %vm1021_vm15, %v1741_v38, %v1018_v9  ;;  %vm1034_vm3 = vweird.f32 %v1743_v47 }
 0x945   :  { %1744 = vrcp.f32 %v998_v49  ;;  %v1027_v51 = vsel %vm1024_vm2, %v1026_v46, %v1022_v50  ;;  %vm1035_vm5 = vmor %vm1033_vm4, %vm1034_vm3  ;;  %v1053_v3 = vand.u32 2147483648, %v998_v49  ;;  %v1051_v6 = vand.u32 2147483647, %v998_v49 }
 0x946   :  { %v1030_v52 = vsub.f32 1.0, %v1029_v21  ;;  %v1126_v53 = vmul.f32 %v2207_v14, %v1027_v51  ;;  %vm1047_vm11 = vweird.f32 %v998_v49 }
 0x947   :  { %v1054_v19 = vor.u32 1.1754944e-38, %v1053_v3  ;;  %vm1052_vm13 = vcmp.eq.f32.partialorder %v1051_v6, 8.507059e+37 }
 0x948   :  { %v1031_v55 = vmul.f32 %v1743_v47, %v1030_v52  ;;  %1635 = vmatmul.msk.f32.vlgmr.msrb.gmra.mxu1 %vm164_vm1, %v1126_v53 }
 0x94a   :  { %v1032_v57 = vadd.f32 %v1743_v47, %v1031_v55 }
 0x94b   :  { %v1745_v59 = vpop.eup %1744 }
 0x94c   :  { %v1043_v61 = vmul.f32 %v1745_v59, %v998_v49  ;;  %v1001_v0 = vpop.xlane.xlu1 %1000  ;;  %v1036_v1 = vsel %vm1035_vm5, %v1743_v47, %v1032_v57  ;;  %vm1048_vm10 = vweird.f32 %v1745_v59 }
 0x94d   :  { %1746 = vrcp.f32 %v1001_v0  ;;  %v1041_v58 = vsel %vm1038_vm9, %v1040_v60, %v1036_v1  ;;  %vm1049_vm12 = vmor %vm1047_vm11, %vm1048_vm10  ;;  %v1067_v23 = vand.u32 2147483648, %v1001_v0  ;;  %v1065_v26 = vand.u32 2147483647, %v1001_v0 }
 0x94e   :  { %v1044_v2 = vsub.f32 1.0, %v1043_v61  ;;  %v1127_v14 = vmul.f32 %v2211_v7, %v1041_v58  ;;  %vm1061_vm15 = vweird.f32 %v1001_v0 }
 0x94f   :  { %v1068_v12 = vor.u32 1.1754944e-38, %v1067_v23  ;;  %vm1066_vm3 = vcmp.eq.f32.partialorder %v1065_v26, 8.507059e+37 }
 0x950   :  { %v1045_v5 = vmul.f32 %v1745_v59, %v1044_v2  ;;  %1636 = vmatmul.msk.f32.gmra.mxu1 %vm164_vm1, %v1127_v14 }
 0x952   :  { %v1046_v8 = vadd.f32 %v1745_v59, %v1045_v5 }
 0x953   :  { %v1747_v10 = vpop.eup %1746 }
 0x954   :  { %v1057_v15 = vmul.f32 %v1747_v10, %v1001_v0  ;;  %v1004_v17 = vpop.xlane.xlu2 %1003  ;;  %v1050_v18 = vsel %vm1049_vm12, %v1745_v59, %v1046_v8  ;;  %vm1062_vm14 = vweird.f32 %v1747_v10 }
 0x955   :  { %1748 = vrcp.f32 %v1004_v17  ;;  %v1055_v11 = vsel %vm1052_vm13, %v1054_v19, %v1050_v18  ;;  %vm1063_vm2 = vmor %vm1061_vm15, %vm1062_vm14  ;;  %v1081_v30 = vand.u32 2147483648, %v1004_v17  ;;  %v1079_v4 = vand.u32 2147483647, %v1004_v17  ;;  %v1216_v18 = vpop.f32.mrf.mxu2 }
 0x956   :  { %v1058_v22 = vsub.f32 1.0, %v1057_v15  ;;  %v1128_v7 = vmul.f32 %v2215_v16, %v1055_v11  ;;  %vm1075_vm5 = vweird.f32 %v1004_v17 }
 0x957   :  { %v1082_v38 = vor.u32 1.1754944e-38, %v1081_v30  ;;  %vm1080_vm10 = vcmp.eq.f32.partialorder %v1079_v4, 8.507059e+37  ;;  %v827_v30 = vld [vmem:[%s2392_s2 + $0x88] sm:$0xff] }
 0x958   :  { %v1059_v24 = vmul.f32 %v1747_v10, %v1058_v22  ;;  %1637 = vmatmul.msk.f32.gmra.mxu1 %vm164_vm1, %v1128_v7 }
 0x95a   :  { %v1060_v35 = vadd.f32 %v1747_v10, %v1059_v24 }
 0x95b   :  { %v1749_v62 = vpop.eup %1748 }
 0x95c   :  { %v1071_v29 = vmul.f32 %v1749_v62, %v1004_v17  ;;  %v1007_v42 = vpop.xlane.xlu0 %1006  ;;  %v1064_v63 = vsel %vm1063_vm2, %v1747_v10, %v1060_v35  ;;  %vm1076_vm4 = vweird.f32 %v1749_v62 }
 0x95d   :  { %1750 = vrcp.f32 %v1007_v42  ;;  %v1069_v27 = vsel %vm1066_vm3, %v1068_v12, %v1064_v63  ;;  %vm1077_vm9 = vmor %vm1075_vm5, %vm1076_vm4  ;;  %v1095_v45 = vand.u32 2147483648, %v1007_v42  ;;  %v1093_v47 = vand.u32 2147483647, %v1007_v42  ;;  %v2255_v11 = vpop.f32.mrf.mxu2  ;;  %v829_v12 = vld [vmem:[%s2392_s2 + $0x98] sm:$0xff] }
 0x95e   :  { %v1072_v28 = vsub.f32 1.0, %v1071_v29  ;;  %v1129_v16 = vmul.f32 %v2219_v20, %v1069_v27  ;;  %vm1089_vm12 = vweird.f32 %v1007_v42 }
 0x95f   :  { %v1096_v49 = vor.u32 1.1754944e-38, %v1095_v45  ;;  %vm1094_vm14 = vcmp.eq.f32.partialorder %v1093_v47, 8.507059e+37  ;;  %v1670_v47 = vld [vmem:[%s2392_s2 + $0x108] ss:$0 sm:$0xff] }
 0x960   :  { %v1073_v32 = vmul.f32 %v1749_v62, %v1072_v28  ;;  %1638 = vmatmul.msk.f32.gmra.mxu1 %vm164_vm1, %v1129_v16  ;;  %v828_v16 = vld [vmem:[%s2392_s2 + $0x90] sm:$0xff] }
 0x962   :  { %v1074_v36 = vadd.f32 %v1749_v62, %v1073_v32 }
 0x963   :  { %v1751_v37 = vpop.eup %1750 }
 0x964   :  { %v1085_v39 = vmul.f32 %v1751_v37, %v1007_v42  ;;  %v1010_v40 = vpop.xlane.xlu1 %1009  ;;  %v1078_v41 = vsel %vm1077_vm9, %v1749_v62, %v1074_v36  ;;  %vm1090_vm11 = vweird.f32 %v1751_v37  ;;  %v830_v62 = vld [vmem:[%s2392_s2 + $0xa0] sm:$0xff] }
 0x965   :  { %1752 = vrcp.f32 %v1010_v40  ;;  %v1083_v43 = vsel %vm1080_vm10, %v1082_v38, %v1078_v41  ;;  %vm1091_vm13 = vmor %vm1089_vm12, %vm1090_vm11  ;;  %v1109_v55 = vand.u32 2147483648, %v1010_v40  ;;  %v1107_v57 = vand.u32 2147483647, %v1010_v40  ;;  %v1222_v7 = vpop.f32.mrf.mxu2  ;;  %1319 = vmatpush.msrb.mxu0 %v830_v62 }
 0x966   :  { %v1086_v44 = vsub.f32 1.0, %v1085_v39  ;;  %v1130_v20 = vmul.f32 %v2223_v48, %v1083_v43  ;;  %vm1103_vm2 = vweird.f32 %v1010_v40 }
 0x967   :  { %v1110_v61 = vor.u32 1.1754944e-38, %v1109_v55  ;;  %vm1108_vm4 = vcmp.eq.f32.partialorder %v1107_v57, 8.507059e+37  ;;  %1320 = vmatpush.msrb.mxu0 %v829_v12 }
 0x968   :  { %v1087_v9 = vmul.f32 %v1751_v37, %v1086_v44  ;;  %1639 = vmatmul.msk.f32.gmra.mxu1 %vm164_vm1, %v1130_v20 }
 0x969   :  { %1321 = vmatpush.msrb.mxu0 %v828_v16 }
 0x96a   :  { %v1088_v46 = vadd.f32 %v1751_v37, %v1087_v9 }
 0x96b   :  { %v1753_v21 = vpop.eup %1752  ;;  %1322 = vmatpush.msrb.mxu0 %v827_v30 }
 0x96c   :  { %v1099_v50 = vmul.f32 %v1753_v21, %v1010_v40  ;;  %v1013_v51 = vpop.xlane.xlu2 %1012  ;;  %v1092_v52 = vsel %vm1091_vm13, %v1751_v37, %v1088_v46  ;;  %vm1104_vm15 = vweird.f32 %v1753_v21 }
 0x96d   :  { %1754 = vrcp.f32 %v1013_v51  ;;  %v1097_v53 = vsel %vm1094_vm14, %v1096_v49, %v1092_v52  ;;  %vm1105_vm3 = vmor %vm1103_vm2, %vm1104_vm15  ;;  %v1123_v3 = vand.u32 2147483648, %v1013_v51  ;;  %v1121_v5 = vand.u32 2147483647, %v1013_v51  ;;  %v1225_v24 = vpop.f32.mrf.mxu2 }
 0x96e   :  { %v1100_v54 = vsub.f32 1.0, %v1099_v50  ;;  %v1131_v48 = vmul.f32 %v2227_v25, %v1097_v53  ;;  %vm1117_vm9 = vweird.f32 %v1013_v51 }
 0x96f   :  { %v1124_v8 = vor.u32 1.1754944e-38, %v1123_v3  ;;  %vm1122_vm11 = vcmp.eq.f32.partialorder %v1121_v5, 8.507059e+37 }
 0x970   :  { %v1101_v56 = vmul.f32 %v1753_v21, %v1100_v54  ;;  %1640 = vmatmul.msk.f32.gmra.mxu1 %vm164_vm1, %v1131_v48 }
 0x972   :  { %v1102_v59 = vadd.f32 %v1753_v21, %v1101_v56 }
 0x973   :  { %v1755_v60 = vpop.eup %1754 }
 0x974   :  { %v1113_v0 = vmul.f32 %v1755_v60, %v1013_v51  ;;  %v1106_v1 = vsel %vm1105_vm3, %v1753_v21, %v1102_v59  ;;  %vm1118_vm5 = vweird.f32 %v1755_v60 }
 0x975   :  { %v1111_v58 = vsel %vm1108_vm4, %v1110_v61, %v1106_v1  ;;  %vm1119_vm10 = vmor %vm1117_vm9, %vm1118_vm5 }
 0x976   :  { %v1114_v2 = vsub.f32 1.0, %v1113_v0  ;;  %v1132_v14 = vmul.f32 %v2231_v31, %v1111_v58 }
 0x978   :  { %v1115_v25 = vmul.f32 %v1755_v60, %v1114_v2  ;;  %1641 = vmatmul.msk.f32.gmra.mxu1 %vm164_vm1, %v1132_v14 }
 0x97a   :  { %v1116_v6 = vadd.f32 %v1755_v60, %v1115_v25 }
 0x97c   :  { %v1120_v10 = vsel %vm1119_vm10, %v1755_v60, %v1116_v6 }
 0x97d   :  { %v1125_v19 = vsel %vm1122_vm11, %v1124_v8, %v1120_v10 }
 0x97e   :  { %v1133_v15 = vmul.f32 %v2235_v34, %v1125_v19  ;;  %v1228_v34 = vpop.f32.mrf.mxu2 }
 0x980   :  { %1642 = vmatmul.msk.f32.gmra.mxu1 %vm164_vm1, %v1133_v15 }
 0x986   :  { %v1231_v42 = vpop.f32.mrf.mxu2 }
 0x98e   :  { %v1234_v27 = vpop.f32.mrf.mxu2 }
 0x996   :  { %v1237_v28 = vpop.f32.mrf.mxu2 }
 0x9c5   :  { %v1175_v17 = vpop.f32.mrf.mxu1 }
 0x9cd   :  { %v1178_v31 = vpop.f32.mrf.mxu1 }
 0x9d5   :  { %v1181_v22 = vpop.f32.mrf.mxu1 }
 0x9d6   :  { %1242 = vrot.lane.b32.xlu0 %v1181_v22, %s1798_s5 }
 0x9dd   :  { %v1184_v23 = vpop.f32.mrf.mxu1 }
 0x9de   :  { %1244 = vrot.lane.b32.xlu0 %v1184_v23, %s1798_s5  ;;  %v833_v23 = vld [vmem:[%s2392_s2 + $0xb8] sm:$0xff] }
 0x9e5   :  { %v1187_v26 = vpop.f32.mrf.mxu1 }
 0x9e6   :  { %1250 = vrot.lane.b32.xlu1 %v1187_v26, %s1799_s6  ;;  %v832_v26 = vld [vmem:[%s2392_s2 + $0xb0] sm:$0xff] }
 0x9ed   :  { %v1190_v35 = vpop.f32.mrf.mxu1 }
 0x9ee   :  { %1252 = vrot.lane.b32.xlu1 %v1190_v35, %s1799_s6  ;;  %v831_v35 = vld [vmem:[%s2392_s2 + $0xa8] sm:$0xff] }
 0x9f5   :  { %v1193_v29 = vpop.f32.mrf.mxu1 }
 0x9f6   :  { %1280 = vrot.lane.b32.xlu1 %v1228_v34, %s1799_s6  ;;  %1258 = vrot.lane.b32.xlu2 %v1193_v29, %s1800_s7 }
 0x9fd   :  { %v1196_v63 = vpop.f32.mrf.mxu1 }
 0x9fe   :  { %1282 = vrot.lane.b32.xlu1 %v1231_v42, %s1799_s6  ;;  %1272 = vrot.lane.b32.xlu2 %v1222_v7, %s1798_s5  ;;  %s2379_s6 = sld [smem:[#allocation2 + $0x7]] }
 0x9ff   :  { %1260 = vrot.lane.b32.xlu0 %v1196_v63, %s1800_s7 }
 0xa06   :  { %1274 = vrot.lane.b32.xlu2 %v1225_v24, %s1798_s5 }
 0xa07   :  { %1288 = vrot.lane.b32.xlu0 %v1234_v27, %s1800_s7 }
 0xa0f   :  { %1290 = vrot.lane.b32.xlu0 %v1237_v28, %s1800_s7  ;;  %s1804_s7 = smov 32  }
 0xa48   :  { %v1243_v32 = vpop.permute.xlu0 %1242 }
 0xa49   :  { %v1264_v4 = vsel %vm90_vm0, %v1175_v17, %v1243_v32 }
 0xa50   :  { %v1259_v37 = vpop.permute.xlu2 %1258  ;;  %v1245_v40 = vpop.permute.xlu0 %1244 }
 0xa51   :  { %v1265_v43 = vsel %vm90_vm0, %v1178_v31, %v1245_v40 }
 0xa58   :  { %v1251_v36 = vpop.permute.xlu1 %1250  ;;  %v1273_v9 = vpop.permute.xlu2 %1272 }
 0xa59   :  { %v1266_v38 = vsel %vm513_vm6, %v1264_v4, %v1251_v36  ;;  %v1294_v49 = vsel %vm90_vm0, %v1216_v18, %v1273_v9  ;;  %v842_v9 = vld [vmem:[%s2392_s2 + $0x100] sm:$0xff] }
 0xa5a   :  { %v1268_v39 = vsel %vm516_vm7, %v1266_v38, %v1259_v37 }
 0xa5b   :  { %1651 = vmatmul.msk.f32.vlgmr.msrb.gmra.mxu0 %vm550_vm8, %v1268_v39 }
 0xa60   :  { %v1253_v41 = vpop.permute.xlu1 %1252  ;;  %v1275_v55 = vpop.permute.xlu2 %1274 }
 0xa61   :  { %v1267_v44 = vsel %vm513_vm6, %v1265_v43, %v1253_v41  ;;  %v1295_v59 = vsel %vm90_vm0, %v2255_v11, %v1275_v55  ;;  %v834_v11 = vld [vmem:[%s2392_s2 + $0xc0] sm:$0xff]  ;;  %v839_v55 = vld [vmem:[%s2392_s2 + $0xe8] sm:$0xff] }
 0xa62   :  { %1433 = vmatpush.msra.mxu0 %v834_v11  ;;  %v837_v11 = vld [vmem:[%s2392_s2 + $0xd8] sm:$0xff] }
 0xa64   :  { %1434 = vmatpush.msra.mxu0 %v833_v23 }
 0xa66   :  { %1435 = vmatpush.msra.mxu0 %v832_v26 }
 0xa68   :  { %v1281_v46 = vpop.permute.xlu1 %1280  ;;  %1436 = vmatpush.msra.mxu0 %v831_v35 }
 0xa69   :  { %v1296_v51 = vsel %vm513_vm6, %v1294_v49, %v1281_v46 }
 0xa6a   :  { %1464 = vmatpush.msrb.mxu0 %v842_v9 }
 0xa70   :  { %v1283_v56 = vpop.permute.xlu1 %1282 }
 0xa71   :  { %v1261_v20 = vpop.permute.xlu0 %1260  ;;  %v1297_v61 = vsel %vm513_vm6, %v1295_v59, %v1283_v56 }
 0xa72   :  { %v1269_v45 = vsel %vm516_vm7, %v1267_v44, %v1261_v20  ;;  %v1406_v44 = vstv %s2324_s30 }
 0xa73   :  { %1652 = vmatmul.msk.f32.gmra.mxu0 %vm550_vm8, %v1269_v45 }
 0xa79   :  { %v1289_v21 = vpop.permute.xlu0 %1288 }
 0xa7a   :  { %v1298_v53 = vsel %vm516_vm7, %v1296_v51, %v1289_v21  ;;  %v840_v51 = vld [vmem:[%s2392_s2 + $0xf0] sm:$0xff] }
 0xa81   :  { %v1291_v57 = vpop.permute.xlu0 %1290 }
 0xa82   :  { %v1299_v1 = vsel %vm516_vm7, %v1297_v61, %v1291_v57 }
 0xad8   :  { %v1324_v50 = vpop.f32.mrf.mxu0 }
 0xad9   :  { %v1325_v52 = vadd.f32 %v1670_v47, %v1324_v50 }
 0xadb   :  { %v1330_v54 = vadd.f32 %v1325_v52, %v1298_v53 }
 0xadd   :  { %v1332_v48 = vsel %vm550_vm8, %v1330_v54, 0.0 }
 0xade   :  { %1333 = vadd.xlane.f32.xlu2 %v1332_v48 }
 0xaf0   :  { %v1327_v60 = vpop.f32.mrf.mxu0 }
 0xaf1   :  { %v1328_v0 = vadd.f32 %v1670_v47, %v1327_v60  ;;  %v838_v60 = vld [vmem:[%s2392_s2 + $0xe0] sm:$0xff] }
 0xaf3   :  { %v1331_v58 = vadd.f32 %v1328_v0, %v1299_v1 }
 0xaf5   :  { %v1335_v2 = vsel %vm550_vm8, %v1331_v58, 0.0 }
 0xaf6   :  { %1336 = vadd.xlane.f32.xlu1 %v1335_v2 }
 0xb0f   :  { %1447 = vrot.lane.b32.xlu1 %v1670_v47, %s1803_s16  ;;  %v841_v47 = vld [vmem:[%s2392_s2 + $0xf8] sm:$0xff] }
 0xb10   :  { %1465 = vmatpush.msrb.mxu0 %v841_v47 }
 0xb12   :  { %1466 = vmatpush.msrb.mxu0 %v840_v51 }
 0xb14   :  { %1467 = vmatpush.msrb.mxu0 %v839_v55 }
 0xb16   :  { %1468 = vmatpush.msrb.mxu0 %v838_v60 }
 0xb18   :  { %1469 = vmatpush.msrb.mxu0 %v837_v11 }
 0xb51   :  { %v1334_v14 = vpop.xlane.xlu2 %1333 }
 0xb52   :  { %v1338_v3 = vmul.f32 %v1334_v14, %v2047_v13 }
 0xb54   :  { %v1340_v25 = vsub.f32 %v1330_v54, %v1338_v3  ;;  %v1411_v54 = vstv %s2326_s8 }
 0xb56   :  { %v1342_v5 = vmul.f32 %v1340_v25, %v1340_v25  ;;  %v1407_v49 = vmul.f32 %v1406_v44, %v1340_v25 }
 0xb58   :  { %v1344_v6 = vsel %vm550_vm8, %v1342_v5, 0.0 }
 0xb59   :  { %1345 = vadd.xlane.f32.xlu0 %v1344_v6 }
 0xb69   :  { %v1337_v8 = vpop.xlane.xlu1 %1336 }
 0xb6a   :  { %v1339_v10 = vmul.f32 %v1337_v8, %v2047_v13 }
 0xb6c   :  { %v2305_v19 = vsub.f32 %v1331_v58, %v1339_v10 }
 0xb6e   :  { %v1343_v15 = vmul.f32 %v2305_v19, %v2305_v19  ;;  %v1408_v10 = vmul.f32 %v1406_v44, %v2305_v19  ;;  %v835_v19 = vld [vmem:[%s2392_s2 + $0xc8] sm:$0xff] }
 0xb70   :  { %v1347_v17 = vsel %vm550_vm8, %v1343_v15, 0.0 }
 0xb71   :  { %1348 = vadd.xlane.f32.xlu2 %v1347_v17 }
 0xbcc   :  { %v1346_v18 = vpop.xlane.xlu0 %1345 }
 0xbcd   :  { %v1350_v31 = vmul.f32 %v1346_v18, %v2061_v33 }
 0xbcf   :  { %1756 = vrsqrt.f32 %v1350_v31  ;;  %vm1359_vm0 = vcmp.eq.f32.partialorder %v1350_v31, inf  ;;  %v1362_v42 = vand.u32 2147483648, %v1350_v31  ;;  %vm1361_vm6 = vcmp.eq.f32.partialorder %v1350_v31, 0.0 }
 0xbd5   :  { %v1757_v22 = vpop.eup %1756 }
 0xbd6   :  { %v1353_v7 = vmul.f32 %v1757_v22, %v1350_v31 }
 0xbd8   :  { %v1354_v24 = vmul.f32 %v1757_v22, %v1353_v7  ;;  %v1671_v7 = vld [vmem:[%s2392_s2 + $0x109] ss:$0 sm:$0xff] }
 0xbda   :  { %v1355_v34 = vmul.f32 0.5, %v1354_v24 }
 0xbdc   :  { %v1356_v62 = vsub.f32 1.5, %v1355_v34 }
 0xbde   :  { %v1357_v12 = vmul.f32 %v1757_v22, %v1356_v62  ;;  %v836_v22 = vld [vmem:[%s2392_s2 + $0xd0] sm:$0xff]  ;;  %s2364_s2 = sld [smem:[#allocation2 + $0x6]] }
 0xbdf   :  { %1470 = vmatpush.msrb.mxu0 %v836_v22 }
 0xbe0   :  { %v1358_v29 = vmul.f32 %v1357_v12, %v1350_v31  ;;  %v1448_v12 = vpop.permute.xlu1 %1447 }
 0xbe1   :  { %1471 = vmatpush.msrb.mxu0 %v835_v19 }
 0xbe2   :  { %v1360_v63 = vsel %vm1359_vm0, %v1350_v31, %v1358_v29 }
 0xbe3   :  { %v1363_v27 = vsel %vm1361_vm6, %v1362_v42, %v1360_v63 }
 0xbe4   :  { %v1376_v28 = vadd.f32 1e-12, %v1363_v27  ;;  %v1349_v16 = vpop.xlane.xlu2 %1348 }
 0xbe5   :  { %v1351_v30 = vmul.f32 %v1349_v16, %v2061_v33 }
 0xbe6   :  { %1758 = vrcp.f32 %v1376_v28  ;;  %v1389_v40 = vand.u32 2147483648, %v1376_v28  ;;  %v1387_v43 = vand.u32 2147483647, %v1376_v28  ;;  %vm1383_vm12 = vweird.f32 %v1376_v28 }
 0xbe7   :  { %1760 = vrsqrt.f32 %v1351_v30  ;;  %vm1371_vm15 = vcmp.eq.f32.partialorder %v1351_v30, inf  ;;  %v1374_v57 = vand.u32 2147483648, %v1351_v30  ;;  %vm1373_vm2 = vcmp.eq.f32.partialorder %v1351_v30, 0.0 }
 0xbe8   :  { %v1390_v21 = vor.u32 1.1754944e-38, %v1389_v40  ;;  %vm1388_vm14 = vcmp.eq.f32.partialorder %v1387_v43, 8.507059e+37 }
 0xbec   :  { %v1759_v32 = vpop.eup %1758 }
 0xbed   :  { %v1761_v4 = vpop.eup %1760  ;;  %v1379_v36 = vmul.f32 %v1759_v32, %v1376_v28  ;;  %vm1384_vm7 = vweird.f32 %v1759_v32 }
 0xbee   :  { %v1365_v37 = vmul.f32 %v1761_v4, %v1351_v30  ;;  %vm1385_vm13 = vmor %vm1383_vm12, %vm1384_vm7 }
 0xbef   :  { %v1380_v38 = vsub.f32 1.0, %v1379_v36 }
 0xbf0   :  { %v1366_v39 = vmul.f32 %v1761_v4, %v1365_v37  ;;  %v1555_v37 = vstv %s2364_s2 }
 0xbf1   :  { %v1381_v41 = vmul.f32 %v1759_v32, %v1380_v38 }
 0xbf2   :  { %v1367_v20 = vmul.f32 0.5, %v1366_v39 }
 0xbf3   :  { %v1382_v45 = vadd.f32 %v1759_v32, %v1381_v41 }
 0xbf4   :  { %v1368_v46 = vsub.f32 1.5, %v1367_v20 }
 0xbf5   :  { %v1386_v50 = vsel %vm1385_vm13, %v1759_v32, %v1382_v45 }
 0xbf6   :  { %v1369_v52 = vmul.f32 %v1761_v4, %v1368_v46  ;;  %v1391_v53 = vsel %vm1388_vm14, %v1390_v21, %v1386_v50 }
 0xbf7   :  { %v1409_v48 = vmul.f32 %v1407_v49, %v1391_v53 }
 0xbf8   :  { %v1370_v56 = vmul.f32 %v1369_v52, %v1351_v30 }
 0xbf9   :  { %v1412_v59 = vadd.f32 %v1411_v54, %v1409_v48 }
 0xbfa   :  { %v1372_v61 = vsel %vm1371_vm15, %v1351_v30, %v1370_v56 }
 0xbfb   :  { %1653 = vmatmul.msk.f32.vlgmr.msra.gmra.mxu0 %vm550_vm8, %v1412_v59  ;;  %v1375_v0 = vsel %vm1373_vm2, %v1374_v57, %v1372_v61 }
 0xbfc   :  { %v1377_v1 = vadd.f32 1e-12, %v1375_v0 }
 0xbfe   :  { %1762 = vrcp.f32 %v1377_v1  ;;  %v1403_v3 = vand.u32 2147483648, %v1377_v1  ;;  %v1401_v5 = vand.u32 2147483647, %v1377_v1  ;;  %vm1397_vm4 = vweird.f32 %v1377_v1 }
 0xc00   :  { %v1404_v8 = vor.u32 1.1754944e-38, %v1403_v3  ;;  %vm1402_vm9 = vcmp.eq.f32.partialorder %v1401_v5, 8.507059e+37 }
 0xc04   :  { %v1763_v58 = vpop.eup %1762 }
 0xc05   :  { %v1393_v2 = vmul.f32 %v1763_v58, %v1377_v1  ;;  %vm1398_vm3 = vweird.f32 %v1763_v58 }
 0xc06   :  { %vm1399_vm5 = vmor %vm1397_vm4, %vm1398_vm3 }
 0xc07   :  { %v1394_v14 = vsub.f32 1.0, %v1393_v2 }
 0xc09   :  { %v1395_v25 = vmul.f32 %v1763_v58, %v1394_v14 }
 0xc0b   :  { %v1396_v6 = vadd.f32 %v1763_v58, %v1395_v25 }
 0xc0d   :  { %v1400_v15 = vsel %vm1399_vm5, %v1763_v58, %v1396_v6 }
 0xc0e   :  { %v1405_v17 = vsel %vm1402_vm9, %v1404_v8, %v1400_v15 }
 0xc0f   :  { %v1410_v18 = vmul.f32 %v1408_v10, %v1405_v17  ;;  %v1560_v17 = vstv %s2379_s6 }
 0xc11   :  { %v1413_v31 = vadd.f32 %v1411_v54, %v1410_v18 }
 0xc13   :  { %1654 = vmatmul.msk.f32.gmra.mxu0 %vm550_vm8, %v1413_v31 }
 0xc78   :  { %v1438_v23 = vpop.f32.mrf.mxu0 }
 0xc79   :  { %v1439_v24 = vadd.f32 %v1671_v7, %v1438_v23 }
 0xc7b   :  { %v1444_v26 = vmax.f32 %v1439_v24, 0.0 }
 0xc7d   :  { %1655 = vmatmul.msk.f32.vlgmr.msrb.gmra.mxu0 %vm164_vm1, %v1444_v26 }
 0xc90   :  { %v1441_v35 = vpop.f32.mrf.mxu0 }
 0xc91   :  { %v1442_v34 = vadd.f32 %v1671_v7, %v1441_v35 }
 0xc93   :  { %v1445_v62 = vmax.f32 %v1442_v34, 0.0 }
 0xc95   :  { %1656 = vmatmul.msk.f32.gmra.mxu0 %vm164_vm1, %v1445_v62 }
 0xcfa   :  { %v1473_v29 = vpop.f32.mrf.mxu0 }
 0xcfb   :  { %v1474_v42 = vadd.f32 %v1473_v29, %v1448_v12 }
 0xcfd   :  { %v1479_v63 = vadd.f32 %v1474_v42, %v1412_v59 }
 0xcff   :  { %v1481_v27 = vsel %vm550_vm8, %v1479_v63, 0.0 }
 0xd00   :  { %1482 = vadd.xlane.f32.xlu2 %v1481_v27 }
 0xd12   :  { %v1476_v28 = vpop.f32.mrf.mxu0 }
 0xd13   :  { %v1477_v16 = vadd.f32 %v1476_v28, %v1448_v12 }
 0xd15   :  { %v1480_v30 = vadd.f32 %v1477_v16, %v1413_v31 }
 0xd17   :  { %v1484_v32 = vsel %vm550_vm8, %v1480_v30, 0.0 }
 0xd18   :  { %1485 = vadd.xlane.f32.xlu0 %v1484_v32 }
 0xd73   :  { %v1483_v4 = vpop.xlane.xlu2 %1482 }
 0xd74   :  { %v1487_v36 = vmul.f32 %v1483_v4, %v2047_v13 }
 0xd76   :  { %v1489_v38 = vsub.f32 %v1479_v63, %v1487_v36 }
 0xd78   :  { %v1556_v39 = vmul.f32 %v1555_v37, %v1489_v38  ;;  %v1491_v40 = vmul.f32 %v1489_v38, %v1489_v38 }
 0xd7a   :  { %v1493_v41 = vsel %vm550_vm8, %v1491_v40, 0.0 }
 0xd7b   :  { %1494 = vadd.xlane.f32.xlu2 %v1493_v41 }
 0xd8b   :  { %v1486_v43 = vpop.xlane.xlu0 %1485 }
 0xd8c   :  { %v1488_v44 = vmul.f32 %v1486_v43, %v2047_v13 }
 0xd8e   :  { %v2372_v20 = vsub.f32 %v1480_v30, %v1488_v44 }
 0xd90   :  { %v1492_v45 = vmul.f32 %v2372_v20, %v2372_v20  ;;  %v1557_v27 = vmul.f32 %v1555_v37, %v2372_v20 }
 0xd92   :  { %v1496_v9 = vsel %vm550_vm8, %v1492_v45, 0.0 }
 0xd93   :  { %1497 = vadd.xlane.f32.xlu0 %v1496_v9 }
 0xdee   :  { %v1495_v47 = vpop.xlane.xlu2 %1494 }
 0xdef   :  { %v1499_v46 = vmul.f32 %v1495_v47, %v2061_v33 }
 0xdf1   :  { %1764 = vrsqrt.f32 %v1499_v46  ;;  %vm1508_vm10 = vcmp.eq.f32.partialorder %v1499_v46, inf  ;;  %v1511_v13 = vand.u32 2147483648, %v1499_v46  ;;  %vm1510_vm11 = vcmp.eq.f32.partialorder %v1499_v46, 0.0 }
 0xdf7   :  { %v1765_v21 = vpop.eup %1764 }
 0xdf8   :  { %v1502_v49 = vmul.f32 %v1765_v21, %v1499_v46 }
 0xdfa   :  { %v1503_v50 = vmul.f32 %v1765_v21, %v1502_v49 }
 0xdfc   :  { %v1504_v51 = vmul.f32 0.5, %v1503_v50 }
 0xdfe   :  { %v1505_v52 = vsub.f32 1.5, %v1504_v51 }
 0xe00   :  { %v1506_v53 = vmul.f32 %v1765_v21, %v1505_v52 }
 0xe02   :  { %v1507_v54 = vmul.f32 %v1506_v53, %v1499_v46 }
 0xe04   :  { %v1509_v48 = vsel %vm1508_vm10, %v1499_v46, %v1507_v54 }
 0xe05   :  { %v1512_v55 = vsel %vm1510_vm11, %v1511_v13, %v1509_v48 }
 0xe06   :  { %v1498_v56 = vpop.xlane.xlu0 %1497  ;;  %v1525_v57 = vadd.f32 1e-12, %v1512_v55 }
 0xe07   :  { %v1500_v59 = vmul.f32 %v1498_v56, %v2061_v33 }
 0xe08   :  { %1766 = vrcp.f32 %v1525_v57  ;;  %v1538_v14 = vand.u32 2147483648, %v1525_v57  ;;  %v1536_v25 = vand.u32 2147483647, %v1525_v57  ;;  %vm1532_vm6 = vweird.f32 %v1525_v57 }
 0xe09   :  { %1768 = vrsqrt.f32 %v1500_v59  ;;  %vm1520_vm13 = vcmp.eq.f32.partialorder %v1500_v59, inf  ;;  %v1523_v22 = vand.u32 2147483648, %v1500_v59  ;;  %vm1522_vm14 = vcmp.eq.f32.partialorder %v1500_v59, 0.0 }
 0xe0a   :  { %v1539_v33 = vor.u32 1.1754944e-38, %v1538_v14  ;;  %vm1537_vm12 = vcmp.eq.f32.partialorder %v1536_v25, 8.507059e+37 }
 0xe0e   :  { %v1767_v60 = vpop.eup %1766 }
 0xe0f   :  { %v1769_v61 = vpop.eup %1768  ;;  %v1528_v0 = vmul.f32 %v1767_v60, %v1525_v57  ;;  %vm1533_vm0 = vweird.f32 %v1767_v60 }
 0xe10   :  { %v1514_v1 = vmul.f32 %v1769_v61, %v1500_v59  ;;  %vm1534_vm7 = vmor %vm1532_vm6, %vm1533_vm0 }
 0xe11   :  { %v1529_v58 = vsub.f32 1.0, %v1528_v0 }
 0xe12   :  { %v1515_v2 = vmul.f32 %v1769_v61, %v1514_v1 }
 0xe13   :  { %v1530_v3 = vmul.f32 %v1767_v60, %v1529_v58 }
 0xe14   :  { %v1516_v5 = vmul.f32 0.5, %v1515_v2 }
 0xe15   :  { %v1531_v6 = vadd.f32 %v1767_v60, %v1530_v3 }
 0xe16   :  { %v1517_v8 = vsub.f32 1.5, %v1516_v5 }
 0xe17   :  { %v1535_v10 = vsel %vm1534_vm7, %v1767_v60, %v1531_v6 }
 0xe18   :  { %v1518_v15 = vmul.f32 %v1769_v61, %v1517_v8  ;;  %v1540_v18 = vsel %vm1537_vm12, %v1539_v33, %v1535_v10 }
 0xe19   :  { %v1558_v31 = vmul.f32 %v1556_v39, %v1540_v18 }
 0xe1a   :  { %v1519_v11 = vmul.f32 %v1518_v15, %v1500_v59 }
 0xe1b   :  { %v1561_v19 = vadd.f32 %v1560_v17, %v1558_v31 }
 0xe1c   :  { %v1521_v7 = vsel %vm1520_vm13, %v1500_v59, %v1519_v11 }
 0xe1d   :  { %v1524_v23 = vsel %vm1522_vm14, %v1523_v22, %v1521_v7 }
 0xe1e   :  { %v1526_v24 = vadd.f32 1e-12, %v1524_v23 }
 0xe20   :  { %1770 = vrcp.f32 %v1526_v24  ;;  %v1552_v62 = vand.u32 2147483648, %v1526_v24  ;;  %v1550_v29 = vand.u32 2147483647, %v1526_v24  ;;  %vm1546_vm2 = vweird.f32 %v1526_v24 }
 0xe22   :  { %v1553_v63 = vor.u32 1.1754944e-38, %v1552_v62  ;;  %vm1551_vm4 = vcmp.eq.f32.partialorder %v1550_v29, 8.507059e+37 }
 0xe26   :  { %v1771_v26 = vpop.eup %1770 }
 0xe27   :  { %v1542_v35 = vmul.f32 %v1771_v26, %v1526_v24  ;;  %vm1547_vm15 = vweird.f32 %v1771_v26 }
 0xe28   :  { %vm1548_vm3 = vmor %vm1546_vm2, %vm1547_vm15 }
 0xe29   :  { %v1543_v34 = vsub.f32 1.0, %v1542_v35 }
 0xe2b   :  { %v1544_v12 = vmul.f32 %v1771_v26, %v1543_v34 }
 0xe2d   :  { %v1545_v42 = vadd.f32 %v1771_v26, %v1544_v12 }
 0xe2f   :  { %v1549_v28 = vsel %vm1548_vm3, %v1771_v26, %v1545_v42 }
 0xe30   :  { %v1554_v16 = vsel %vm1551_vm4, %v1553_v63, %v1549_v28 }
 0xe31   :  { %v1559_v30 = vmul.f32 %v1557_v27, %v1554_v16 }
 0xe33   :  { %v1562_v32 = vadd.f32 %v1560_v17, %v1559_v30 }
 0xe35   :  { %1564 = vrot.lane.b32.xlu0 %v1562_v32, %s1804_s7 }
 0xea7   :  { %v1565_v4 = vpop.permute.xlu0 %1564 }
 0xea8   :  { %v1567_v36 = vsel %vm550_vm8, %v1561_v19, %v1565_v4 }
 0xea9   :  { %1568 = vst.msk [vmem:[%s2394_s4] sm:$0xff] %vm164_vm1, %v1567_v36 }
 0xeaa   :  { %1573 = vsyncpa [#allocation3], 1 }

</bundles_post_ra>
